<compile_context>
chip_gen: v6e
topology: v6e:2x2x1
jax: 0.10.0
libtpu: 0.0.40
codegen_flags: <defaults>
</compile_context>

<pallas_src>
import functools
import numpy as np
import jax
import jax.numpy as jnp
from jax.experimental import pallas as pl
from jax.experimental.pallas import tpu as pltpu


# ------------------------------------------------------------------ kernel ---

def _stna_kernel(x_ref, proj_ref, gamma_ref, beta_ref, mask_ref,
                 wcat_ref, bcat_ref, wz_ref, wz1_ref, zb_ref,
                 mbq_ref, mbt_ref, z_ref, loss_ref, gtp_scr,
                 *, center, eps, inv_n):
    b_blk, t, hw, _ = x_ref.shape              # pixel-major frames (hw, c)
    cpad = wcat_ref.shape[1] // 3              # 128-lane padded inter_channels
    bt = b_blk * t
    f32, bf16 = jnp.float32, jnp.bfloat16

    gamma = gamma_ref[...]                     # (1, c)
    beta = beta_ref[...]                       # (1, c)

    # ---- GroupNorm statistics: ONE (2*bt, c)@(c, c) GEMM for every frame ----
    rows = []
    for bb in range(b_blk):
        for i in range(t):
            xi = x_ref[bb, i]                                    # (hw, c) f32
            rows.append(jnp.sum(xi, axis=0, keepdims=True))      # sum x
            rows.append(jnp.sum(xi * xi, axis=0, keepdims=True)) # sum x^2
    stats = jnp.concatenate(rows, axis=0)                        # (2*bt, c)
    stats = jnp.dot(stats, proj_ref[...],
                    preferred_element_type=f32) * inv_n          # group means

    # ---- normalize + merged g|theta|phi projection: ONE (bt*hw, c) GEMM ----
    hn = []
    for f in range(bt):
        bb, i = divmod(f, t)
        mean_c = stats[2 * f:2 * f + 1]                          # (1, c)
        var_c = jnp.maximum(stats[2 * f + 1:2 * f + 2] - mean_c * mean_c, 0.0)
        rstd_c = jax.lax.rsqrt(var_c + eps)                      # eps = 1e-6 (module)
        xi = x_ref[bb, i]
        hn.append(((xi - mean_c) * (rstd_c * gamma) + beta).astype(bf16))
    hn_all = jnp.concatenate(hn, axis=0)                         # (bt*hw, c) bf16
    gtp_scr[...] = (jnp.dot(hn_all, wcat_ref[...],
                            preferred_element_type=f32)
                    + bcat_ref[...])                             # (bt*hw, 3*cpad)

    # ---- per-(sample, frame) 3x3 neighborhood attention (lane-aligned) ----
    mask = mask_ref[...]                                         # (hw, hw) additive
    att_rows = []
    phi_rows = []
    for bb in range(b_blk):
        base = bb * t * hw
        phi_s = gtp_scr[base + center * hw: base + (center + 1) * hw,
                        2 * cpad:3 * cpad]                       # (hw, cpad) f32
        phi_rows.append(phi_s)
        phi_bf = phi_s.astype(bf16)
        att_f = []
        for i in range(t):
            r0 = base + i * hw
            g_i = gtp_scr[r0:r0 + hw, 0:cpad].astype(bf16)
            th_i = gtp_scr[r0:r0 + hw, cpad:2 * cpad].astype(bf16)
            # phi @ theta^T on the MXU transposed-RHS path (scale folded in theta)
            logits = jax.lax.dot_general(phi_bf, th_i, (((1,), (1,)), ((), ())),
                                         preferred_element_type=f32) + mask
            logits = logits - jnp.max(logits, axis=-1, keepdims=True)
            p = jnp.exp(logits)
            p = p * pl.reciprocal(jnp.sum(p, axis=-1, keepdims=True), approx=True)
            att_f.append(jnp.dot(p.astype(bf16), g_i,
                                 preferred_element_type=f32).astype(bf16))
        att_rows.append(jnp.concatenate(att_f, axis=1))          # (hw, t*cpad) bf16
    att_all = jnp.concatenate(att_rows, axis=0)                  # (b_blk*hw, t*cpad)
    phi_all = jnp.concatenate(phi_rows, axis=0)                  # (b_blk*hw, cpad) f32

    # W_z over the frame-concatenated correlation: ONE GEMM for the whole block
    wy = jnp.dot(att_all, wz_ref[...], preferred_element_type=f32)

    # ---- memory-bank quantization attention + W_z1 + qloss partial ----
    phi_bf_all = phi_all.astype(bf16)
    f1 = jnp.dot(phi_bf_all, mbq_ref[...], preferred_element_type=f32)  # scale folded
    f1 = f1 - jnp.max(f1, axis=-1, keepdims=True)
    p1 = jnp.exp(f1)
    p1 = p1 * pl.reciprocal(jnp.sum(p1, axis=-1, keepdims=True), approx=True)
    y1 = jnp.dot(p1.astype(bf16), mbt_ref[...], preferred_element_type=f32)

    row_abs = jnp.sum(jnp.abs(phi_all - y1), axis=1, keepdims=True)     # (b_blk*hw, 1)
    loss_ref[...] = jnp.sum(row_abs, axis=0, keepdims=True)             # (1, 1)

    wy1 = jnp.dot(y1.astype(bf16), wz1_ref[...], preferred_element_type=f32)

    # ---- residual: z = W_y + q + W_y1 (pixel-major); q re-read from the ref ----
    z_all = wy + wy1 + zb_ref[...]                                      # (b_blk*hw, c)
    for bb in range(b_blk):
        z_ref[bb] = z_all[bb * hw:(bb + 1) * hw] + x_ref[bb, center]


# --------------------------------------------------------------------- glue ---

def natten_mask(h, w, ksz=3):
    # NATTEN-style neighborhood: window of exactly ksz*ksz keys, shifted inward
    # at the borders. Additive mask: 0 inside window, -1e30 outside.
    hw = h * w
    m = np.full((hw, hw), -1e30, dtype=np.float32)
    for i in range(h):
        ni = min(max(i - ksz // 2, 0), h - ksz)
        for j in range(w):
            nj = min(max(j - ksz // 2, 0), w - ksz)
            for di in range(ksz):
                for dj in range(ksz):
                    m[i * w + j, (ni + di) * w + (nj + dj)] = 0.0
    return m


def group_projector(c, n_groups):
    # (c, c) block-diagonal 0/1 matrix: P[i, j] = 1 iff channels i, j share a
    # GroupNorm group — aggregates per-channel sums into group sums on the MXU.
    gs = c // n_groups
    idx = np.arange(c) // gs
    return (idx[:, None] == idx[None, :]).astype(np.float32)


def init_params(key, in_channels, num_input_frame, mb_slots=256):
    C, Cp = in_channels, in_channels // 2
    ks = jax.random.split(key, 11)

    def u(k, shape, scale):
        return (jax.random.uniform(k, shape, jnp.float32) - 0.5) * 2.0 * scale

    return dict(
        gn_gamma=1.0 + 0.1 * u(ks[0], (C,), 1.0),
        gn_beta=0.1 * u(ks[1], (C,), 1.0),
        g_w=u(ks[2], (C, Cp), C ** -0.5),          g_b=0.01 * u(ks[3], (Cp,), 1.0),
        theta_w=u(ks[4], (C, Cp), C ** -0.5),      theta_b=0.01 * u(ks[5], (Cp,), 1.0),
        phi_w=u(ks[6], (C, Cp), C ** -0.5),        phi_b=0.01 * u(ks[7], (Cp,), 1.0),
        # original module: nn.init.constant_(W_z*, 0) — replaced by small random init
        wz_w=u(ks[8], (Cp * num_input_frame, C), (Cp * num_input_frame) ** -0.5),
        wz_b=jnp.zeros((C,), jnp.float32),
        wz1_w=u(ks[9], (Cp, C), Cp ** -0.5),
        wz1_b=jnp.zeros((C,), jnp.float32),
        mb=jax.random.normal(ks[10], (Cp, mb_slots), jnp.float32),
    )


def _pick_batch_block(b):
    # Amortize per-grid-step overhead, but prefer an even grid length so both
    # v7x TensorCores get equal work under dimension_semantics=("parallel",).
    for cand in (8, 4, 2, 1):
        if b % cand == 0 and (b // cand) % 2 == 0:
            return cand
    for cand in (8, 4, 2, 1):
        if b % cand == 0:
            return cand
    return 1


def stna_forward(params, x, num_input_frame):
    b, t, c, h, w = x.shape
    cp = c // 2
    hw = h * w
    n_groups = 32
    center = (num_input_frame - 1) // 2
    scale = float(cp) ** -0.5
    cpad = ((cp + 127) // 128) * 128            # 128-lane padded inter_channels
    f32, bf16 = jnp.float32, jnp.bfloat16

    b_blk = _pick_batch_block(b)
    nblk = b // b_blk

    # single cheap layout change: NCHW -> pixel-major (b, t, hw, c)
    x_pix = x.reshape(b, t, c, hw).transpose(0, 1, 3, 2)

    # trace-time constants
    proj = jnp.asarray(group_projector(c, n_groups))             # (c, c) f32
    mask = jnp.asarray(natten_mask(h, w, 3))                     # (hw, hw) f32

    def pad_last(a, new):
        return jnp.pad(a, [(0, 0)] * (a.ndim - 1) + [(0, new - a.shape[-1])])

    # merged g|theta|phi weights, each block zero-padded to cpad lanes; the
    # attention scale is folded into theta (weight + bias) and into the
    # memory bank used for the quantization logits (NOT into phi).
    wcat = jnp.concatenate([pad_last(params['g_w'], cpad),
                            pad_last(params['theta_w'] * scale, cpad),
                            pad_last(params['phi_w'], cpad)], axis=1).astype(bf16)
    bcat = jnp.concatenate([pad_last(params['g_b'], cpad),
                            pad_last(params['theta_b'] * scale, cpad),
                            pad_last(params['phi_b'], cpad)]
                           ).reshape(1, 3 * cpad).astype(f32)
    gamma = params['gn_gamma'].reshape(1, c).astype(f32)
    beta = params['gn_beta'].reshape(1, c).astype(f32)
    # W_z rows zero-padded per frame block to match the lane-padded att concat
    wz = jnp.pad(params['wz_w'].reshape(t, cp, c),
                 ((0, 0), (0, cpad - cp), (0, 0))).reshape(t * cpad, c).astype(bf16)
    wz1 = jnp.pad(params['wz1_w'], ((0, cpad - cp), (0, 0))).astype(bf16)
    zb = (params['wz_b'] + params['wz1_b']).reshape(1, c).astype(f32)
    mbq = jnp.pad(params['mb'] * scale, ((0, cpad - cp), (0, 0))).astype(bf16)  # (cpad, M)
    mbt = jnp.pad(params['mb'].T, ((0, 0), (0, cpad - cp))).astype(bf16)        # (M, cpad)
    M = mbq.shape[1]
    inv_n = 1.0 / ((c // n_groups) * hw)        # elements per GroupNorm group

    def const2d(shape):
        return pl.BlockSpec(shape, lambda i: (0, 0))

    z_pix, loss_p = pl.pallas_call(
        functools.partial(_stna_kernel, center=center, eps=1e-6, inv_n=inv_n),
        out_shape=(jax.ShapeDtypeStruct((b, hw, c), f32),
                   jax.ShapeDtypeStruct((nblk, 1, 1), f32)),
        grid=(nblk,),
        in_specs=[pl.BlockSpec((b_blk, t, hw, c), lambda i: (i, 0, 0, 0)),
                  const2d((c, c)),              # proj (GroupNorm group aggregation)
                  const2d((1, c)),              # gamma
                  const2d((1, c)),              # beta
                  const2d((hw, hw)),            # NATTEN additive mask
                  const2d((c, 3 * cpad)),       # wcat (g | theta*scale | phi), padded
                  const2d((1, 3 * cpad)),       # bcat
                  const2d((t * cpad, c)),       # W_z, row-padded per frame block
                  const2d((cpad, c)),           # W_z1, row-padded
                  const2d((1, c)),              # combined W_z + W_z1 bias
                  const2d((cpad, M)),           # mb * scale, row-padded
                  const2d((M, cpad))],          # mb^T, col-padded
        out_specs=(pl.BlockSpec((b_blk, hw, c), lambda i: (i, 0, 0)),
                   pl.BlockSpec((None, 1, 1), lambda i: (i, 0, 0))),
        scratch_shapes=[pltpu.VMEM((b_blk * t * hw, 3 * cpad), jnp.float32)],
        compiler_params=pltpu.CompilerParams(dimension_semantics=("parallel",)),
    )(x_pix, proj, gamma, beta, mask, wcat, bcat, wz, wz1, zb, mbq, mbt)

    z = z_pix.transpose(0, 2, 1).reshape(b, c, h, w)
    qloss = jnp.sum(loss_p) / (b * hw * cp)
    return z, qloss


# --------------------------------------------------------------------- main ---

if __name__ == "__main__":
    key = jax.random.PRNGKey(0)
    # in_channels=128 (GroupNorm(32) needs a multiple of 32; 128 keeps the
    # output lane-dense), 3 frames, 8x8 spatial, batch 2.
    b, t, c, h, w = 2, 3, 128, 8, 8
    kx, kp = jax.random.split(key)
    x = jax.random.normal(kx, (b, t, c, h, w), jnp.float32)
    params = init_params(kp, in_channels=c, num_input_frame=t)

    fwd = jax.jit(functools.partial(stna_forward, num_input_frame=t))
    z, qloss = fwd(params, x)
    jax.block_until_ready((z, qloss))

    assert z.shape == (b, c, h, w), z.shape
    assert bool(jnp.all(jnp.isfinite(z))) and bool(jnp.isfinite(qloss))
    print("KERNEL_OK")
</pallas_src>

<mosaic_0001>
module attributes {stable_mosaic.version = 11 : i64} {
  func.func @_stna_kernel(%arg0: i32, %arg1: memref<1x3x64x128xf32, #tpu.memory_space<vmem>>, %arg2: memref<128x128xf32, #tpu.memory_space<vmem>>, %arg3: memref<1x128xf32, #tpu.memory_space<vmem>>, %arg4: memref<1x128xf32, #tpu.memory_space<vmem>>, %arg5: memref<64x64xf32, #tpu.memory_space<vmem>>, %arg6: memref<128x384xbf16, #tpu.memory_space<vmem>>, %arg7: memref<1x384xf32, #tpu.memory_space<vmem>>, %arg8: memref<384x128xbf16, #tpu.memory_space<vmem>>, %arg9: memref<128x128xbf16, #tpu.memory_space<vmem>>, %arg10: memref<1x128xf32, #tpu.memory_space<vmem>>, %arg11: memref<128x256xbf16, #tpu.memory_space<vmem>>, %arg12: memref<256x128xbf16, #tpu.memory_space<vmem>>, %arg13: memref<1x64x128xf32, #tpu.memory_space<vmem>>, %arg14: memref<1x1x1xf32, #tpu.memory_space<vmem>>, %arg15: memref<192x384xf32, #tpu.memory_space<vmem>>) attributes {dimension_semantics = [#tpu.dimension_semantics<parallel>], iteration_bounds = array<i64: 2>, scalar_prefetch = 0 : i64, scratch_operands = 1 : i64, tpu.core_type = #tpu.core_type<tc>, window_params = [{transform_indices = @transform_0, window_bounds = array<i64: 1, 3, 64, 128>}, {pipeline_mode = #tpu.pipeline_mode<synchronous>, transform_indices = @transform_1, window_bounds = array<i64: 128, 128>}, {pipeline_mode = #tpu.pipeline_mode<synchronous>, transform_indices = @transform_2, window_bounds = array<i64: 1, 128>}, {pipeline_mode = #tpu.pipeline_mode<synchronous>, transform_indices = @transform_3, window_bounds = array<i64: 1, 128>}, {pipeline_mode = #tpu.pipeline_mode<synchronous>, transform_indices = @transform_4, window_bounds = array<i64: 64, 64>}, {pipeline_mode = #tpu.pipeline_mode<synchronous>, transform_indices = @transform_5, window_bounds = array<i64: 128, 384>}, {pipeline_mode = #tpu.pipeline_mode<synchronous>, transform_indices = @transform_6, window_bounds = array<i64: 1, 384>}, {pipeline_mode = #tpu.pipeline_mode<synchronous>, transform_indices = @transform_7, window_bounds = array<i64: 384, 128>}, {pipeline_mode = #tpu.pipeline_mode<synchronous>, transform_indices = @transform_8, window_bounds = array<i64: 128, 128>}, {pipeline_mode = #tpu.pipeline_mode<synchronous>, transform_indices = @transform_9, window_bounds = array<i64: 1, 128>}, {pipeline_mode = #tpu.pipeline_mode<synchronous>, transform_indices = @transform_10, window_bounds = array<i64: 128, 256>}, {pipeline_mode = #tpu.pipeline_mode<synchronous>, transform_indices = @transform_11, window_bounds = array<i64: 256, 128>}, {transform_indices = @transform_12, window_bounds = array<i64: 1, 64, 128>}, {transform_indices = @transform_13, window_bounds = array<i64: 1, 1, 1>}]} {
    %c0 = arith.constant 0 : index
    %c0_0 = arith.constant 0 : index
    %0 = vector.load %arg3[%c0, %c0_0] : memref<1x128xf32, #tpu.memory_space<vmem>>, vector<1x128xf32>
    %c0_1 = arith.constant 0 : index
    %c0_2 = arith.constant 0 : index
    %1 = vector.load %arg4[%c0_1, %c0_2] : memref<1x128xf32, #tpu.memory_space<vmem>>, vector<1x128xf32>
    %c0_3 = arith.constant 0 : index
    %c0_4 = arith.constant 0 : index
    %c0_5 = arith.constant 0 : index
    %c0_6 = arith.constant 0 : index
    %2 = vector.load %arg1[%c0_3, %c0_4, %c0_5, %c0_6] : memref<1x3x64x128xf32, #tpu.memory_space<vmem>>, vector<1x1x64x128xf32>
    %3 = vector.shape_cast %2 : vector<1x1x64x128xf32> to vector<64x128xf32>
    %cst = arith.constant dense<0.000000e+00> : vector<128xf32>
    %4 = vector.multi_reduction <add>, %3, %cst [0] : vector<64x128xf32> to vector<128xf32>
    %5 = vector.shape_cast %4 : vector<128xf32> to vector<1x128xf32>
    %6 = arith.mulf %3, %3 : vector<64x128xf32>
    %cst_7 = arith.constant dense<0.000000e+00> : vector<128xf32>
    %7 = vector.multi_reduction <add>, %6, %cst_7 [0] : vector<64x128xf32> to vector<128xf32>
    %8 = vector.shape_cast %7 : vector<128xf32> to vector<1x128xf32>
    %c0_8 = arith.constant 0 : index
    %c1 = arith.constant 1 : index
    %c0_9 = arith.constant 0 : index
    %c0_10 = arith.constant 0 : index
    %9 = vector.load %arg1[%c0_8, %c1, %c0_9, %c0_10] : memref<1x3x64x128xf32, #tpu.memory_space<vmem>>, vector<1x1x64x128xf32>
    %10 = vector.shape_cast %9 : vector<1x1x64x128xf32> to vector<64x128xf32>
    %cst_11 = arith.constant dense<0.000000e+00> : vector<128xf32>
    %11 = vector.multi_reduction <add>, %10, %cst_11 [0] : vector<64x128xf32> to vector<128xf32>
    %12 = vector.shape_cast %11 : vector<128xf32> to vector<1x128xf32>
    %13 = arith.mulf %10, %10 : vector<64x128xf32>
    %cst_12 = arith.constant dense<0.000000e+00> : vector<128xf32>
    %14 = vector.multi_reduction <add>, %13, %cst_12 [0] : vector<64x128xf32> to vector<128xf32>
    %15 = vector.shape_cast %14 : vector<128xf32> to vector<1x128xf32>
    %c0_13 = arith.constant 0 : index
    %c2 = arith.constant 2 : index
    %c0_14 = arith.constant 0 : index
    %c0_15 = arith.constant 0 : index
    %16 = vector.load %arg1[%c0_13, %c2, %c0_14, %c0_15] : memref<1x3x64x128xf32, #tpu.memory_space<vmem>>, vector<1x1x64x128xf32>
    %17 = vector.shape_cast %16 : vector<1x1x64x128xf32> to vector<64x128xf32>
    %cst_16 = arith.constant dense<0.000000e+00> : vector<128xf32>
    %18 = vector.multi_reduction <add>, %17, %cst_16 [0] : vector<64x128xf32> to vector<128xf32>
    %19 = vector.shape_cast %18 : vector<128xf32> to vector<1x128xf32>
    %20 = arith.mulf %17, %17 : vector<64x128xf32>
    %cst_17 = arith.constant dense<0.000000e+00> : vector<128xf32>
    %21 = vector.multi_reduction <add>, %20, %cst_17 [0] : vector<64x128xf32> to vector<128xf32>
    %22 = vector.shape_cast %21 : vector<128xf32> to vector<1x128xf32>
    %23 = tpu.concatenate %5, %8, %12, %15, %19, %22 in 0 : vector<1x128xf32>, vector<1x128xf32>, vector<1x128xf32>, vector<1x128xf32>, vector<1x128xf32>, vector<1x128xf32> -> vector<6x128xf32>
    %c0_18 = arith.constant 0 : index
    %c0_19 = arith.constant 0 : index
    %24 = vector.load %arg2[%c0_18, %c0_19] : memref<128x128xf32, #tpu.memory_space<vmem>>, vector<128x128xf32>
    %cst_20 = arith.constant dense<0.000000e+00> : vector<6x128xf32>
    %25 = tpu.matmul %23, %24, %cst_20 {dimension_numbers = #tpu.dot_dimension_numbers<[1], [0], [0], [1], [0, 0, 1, 1], [], []>} : vector<6x128xf32>, vector<128x128xf32>, vector<6x128xf32> -> vector<6x128xf32>
    %cst_21 = arith.constant 3.906250e-03 : f32
    %26 = vector.broadcast %cst_21 : f32 to vector<6x128xf32>
    %27 = arith.mulf %25, %26 : vector<6x128xf32>
    %28 = vector.extract_strided_slice %27 {offsets = [0, 0], sizes = [1, 128], strides = [1, 1]} : vector<6x128xf32> to vector<1x128xf32>
    %29 = vector.extract_strided_slice %27 {offsets = [1, 0], sizes = [1, 128], strides = [1, 1]} : vector<6x128xf32> to vector<1x128xf32>
    %30 = arith.mulf %28, %28 : vector<1x128xf32>
    %31 = arith.subf %29, %30 : vector<1x128xf32>
    %cst_22 = arith.constant 0.000000e+00 : f32
    %32 = vector.broadcast %cst_22 : f32 to vector<1x128xf32>
    %33 = arith.maximumf %31, %32 : vector<1x128xf32>
    %cst_23 = arith.constant 9.99999997E-7 : f32
    %34 = vector.broadcast %cst_23 : f32 to vector<1x128xf32>
    %35 = arith.addf %33, %34 : vector<1x128xf32>
    %36 = math.rsqrt %35 : vector<1x128xf32>
    %c0_24 = arith.constant 0 : index
    %c0_25 = arith.constant 0 : index
    %c0_26 = arith.constant 0 : index
    %c0_27 = arith.constant 0 : index
    %37 = vector.load %arg1[%c0_24, %c0_25, %c0_26, %c0_27] : memref<1x3x64x128xf32, #tpu.memory_space<vmem>>, vector<1x1x64x128xf32>
    %38 = vector.shape_cast %37 : vector<1x1x64x128xf32> to vector<64x128xf32>
    %39 = vector.broadcast %28 : vector<1x128xf32> to vector<64x128xf32>
    %40 = arith.subf %38, %39 : vector<64x128xf32>
    %41 = arith.mulf %36, %0 : vector<1x128xf32>
    %42 = vector.broadcast %41 : vector<1x128xf32> to vector<64x128xf32>
    %43 = arith.mulf %40, %42 : vector<64x128xf32>
    %44 = vector.broadcast %1 : vector<1x128xf32> to vector<64x128xf32>
    %45 = arith.addf %43, %44 : vector<64x128xf32>
    %46 = arith.truncf %45 : vector<64x128xf32> to vector<64x128xbf16>
    %47 = vector.extract_strided_slice %27 {offsets = [2, 0], sizes = [1, 128], strides = [1, 1]} : vector<6x128xf32> to vector<1x128xf32>
    %48 = vector.extract_strided_slice %27 {offsets = [3, 0], sizes = [1, 128], strides = [1, 1]} : vector<6x128xf32> to vector<1x128xf32>
    %49 = arith.mulf %47, %47 : vector<1x128xf32>
    %50 = arith.subf %48, %49 : vector<1x128xf32>
    %cst_28 = arith.constant 0.000000e+00 : f32
    %51 = vector.broadcast %cst_28 : f32 to vector<1x128xf32>
    %52 = arith.maximumf %50, %51 : vector<1x128xf32>
    %cst_29 = arith.constant 9.99999997E-7 : f32
    %53 = vector.broadcast %cst_29 : f32 to vector<1x128xf32>
    %54 = arith.addf %52, %53 : vector<1x128xf32>
    %55 = math.rsqrt %54 : vector<1x128xf32>
    %c0_30 = arith.constant 0 : index
    %c1_31 = arith.constant 1 : index
    %c0_32 = arith.constant 0 : index
    %c0_33 = arith.constant 0 : index
    %56 = vector.load %arg1[%c0_30, %c1_31, %c0_32, %c0_33] : memref<1x3x64x128xf32, #tpu.memory_space<vmem>>, vector<1x1x64x128xf32>
    %57 = vector.shape_cast %56 : vector<1x1x64x128xf32> to vector<64x128xf32>
    %58 = vector.broadcast %47 : vector<1x128xf32> to vector<64x128xf32>
    %59 = arith.subf %57, %58 : vector<64x128xf32>
    %60 = arith.mulf %55, %0 : vector<1x128xf32>
    %61 = vector.broadcast %60 : vector<1x128xf32> to vector<64x128xf32>
    %62 = arith.mulf %59, %61 : vector<64x128xf32>
    %63 = vector.broadcast %1 : vector<1x128xf32> to vector<64x128xf32>
    %64 = arith.addf %62, %63 : vector<64x128xf32>
    %65 = arith.truncf %64 : vector<64x128xf32> to vector<64x128xbf16>
    %66 = vector.extract_strided_slice %27 {offsets = [4, 0], sizes = [1, 128], strides = [1, 1]} : vector<6x128xf32> to vector<1x128xf32>
    %67 = vector.extract_strided_slice %27 {offsets = [5, 0], sizes = [1, 128], strides = [1, 1]} : vector<6x128xf32> to vector<1x128xf32>
    %68 = arith.mulf %66, %66 : vector<1x128xf32>
    %69 = arith.subf %67, %68 : vector<1x128xf32>
    %cst_34 = arith.constant 0.000000e+00 : f32
    %70 = vector.broadcast %cst_34 : f32 to vector<1x128xf32>
    %71 = arith.maximumf %69, %70 : vector<1x128xf32>
    %cst_35 = arith.constant 9.99999997E-7 : f32
    %72 = vector.broadcast %cst_35 : f32 to vector<1x128xf32>
    %73 = arith.addf %71, %72 : vector<1x128xf32>
    %74 = math.rsqrt %73 : vector<1x128xf32>
    %c0_36 = arith.constant 0 : index
    %c2_37 = arith.constant 2 : index
    %c0_38 = arith.constant 0 : index
    %c0_39 = arith.constant 0 : index
    %75 = vector.load %arg1[%c0_36, %c2_37, %c0_38, %c0_39] : memref<1x3x64x128xf32, #tpu.memory_space<vmem>>, vector<1x1x64x128xf32>
    %76 = vector.shape_cast %75 : vector<1x1x64x128xf32> to vector<64x128xf32>
    %77 = vector.broadcast %66 : vector<1x128xf32> to vector<64x128xf32>
    %78 = arith.subf %76, %77 : vector<64x128xf32>
    %79 = arith.mulf %74, %0 : vector<1x128xf32>
    %80 = vector.broadcast %79 : vector<1x128xf32> to vector<64x128xf32>
    %81 = arith.mulf %78, %80 : vector<64x128xf32>
    %82 = vector.broadcast %1 : vector<1x128xf32> to vector<64x128xf32>
    %83 = arith.addf %81, %82 : vector<64x128xf32>
    %84 = arith.truncf %83 : vector<64x128xf32> to vector<64x128xbf16>
    %85 = tpu.concatenate %46, %65, %84 in 0 : vector<64x128xbf16>, vector<64x128xbf16>, vector<64x128xbf16> -> vector<192x128xbf16>
    %c0_40 = arith.constant 0 : index
    %c0_41 = arith.constant 0 : index
    %86 = vector.load %arg6[%c0_40, %c0_41] : memref<128x384xbf16, #tpu.memory_space<vmem>>, vector<128x384xbf16>
    %cst_42 = arith.constant dense<0.000000e+00> : vector<192x384xf32>
    %87 = tpu.matmul %85, %86, %cst_42 {dimension_numbers = #tpu.dot_dimension_numbers<[1], [0], [0], [1], [0, 0, 1, 1], [], []>} : vector<192x128xbf16>, vector<128x384xbf16>, vector<192x384xf32> -> vector<192x384xf32>
    %c0_43 = arith.constant 0 : index
    %c0_44 = arith.constant 0 : index
    %88 = vector.load %arg7[%c0_43, %c0_44] : memref<1x384xf32, #tpu.memory_space<vmem>>, vector<1x384xf32>
    %89 = vector.broadcast %88 : vector<1x384xf32> to vector<192x384xf32>
    %90 = arith.addf %87, %89 : vector<192x384xf32>
    %c0_45 = arith.constant 0 : index
    %c0_46 = arith.constant 0 : index
    %91 = vector.load %arg15[%c0_45, %c0_46] : memref<192x384xf32, #tpu.memory_space<vmem>>, vector<192x384xf32>
    tpu.vector_store %arg15[%c0_45, %c0_46], %90 {strides = array<i32>} : memref<192x384xf32, #tpu.memory_space<vmem>>, vector<192x384xf32>,
    %c0_47 = arith.constant 0 : index
    %c0_48 = arith.constant 0 : index
    %92 = vector.load %arg5[%c0_47, %c0_48] : memref<64x64xf32, #tpu.memory_space<vmem>>, vector<64x64xf32>
    %c64 = arith.constant 64 : index
    %c256 = arith.constant 256 : index
    %93 = vector.load %arg15[%c64, %c256] : memref<192x384xf32, #tpu.memory_space<vmem>>, vector<64x128xf32>
    %94 = arith.truncf %93 : vector<64x128xf32> to vector<64x128xbf16>
    %c0_49 = arith.constant 0 : index
    %c0_50 = arith.constant 0 : index
    %95 = vector.load %arg15[%c0_49, %c0_50] : memref<192x384xf32, #tpu.memory_space<vmem>>, vector<64x128xf32>
    %96 = arith.truncf %95 : vector<64x128xf32> to vector<64x128xbf16>
    %c0_51 = arith.constant 0 : index
    %c128 = arith.constant 128 : index
    %97 = vector.load %arg15[%c0_51, %c128] : memref<192x384xf32, #tpu.memory_space<vmem>>, vector<64x128xf32>
    %98 = arith.truncf %97 : vector<64x128xf32> to vector<64x128xbf16>
    %cst_52 = arith.constant dense<0.000000e+00> : vector<64x64xf32>
    %99 = tpu.matmul %94, %98, %cst_52 {dimension_numbers = #tpu.dot_dimension_numbers<[1], [1], [0], [0], [0, 0, 1, 0], [], []>} : vector<64x128xbf16>, vector<64x128xbf16>, vector<64x64xf32> -> vector<64x64xf32>
    %100 = arith.addf %99, %92 : vector<64x64xf32>
    %cst_53 = arith.constant dense<0xFF800000> : vector<64xf32>
    %101 = vector.multi_reduction <maximumf>, %100, %cst_53 [1] : vector<64x64xf32> to vector<64xf32>
    %102 = vector.shape_cast %101 : vector<64xf32> to vector<64x1xf32>
    %103 = vector.broadcast %102 : vector<64x1xf32> to vector<64x64xf32>
    %104 = arith.subf %100, %103 : vector<64x64xf32>
    %105 = math.exp %104 : vector<64x64xf32>
    %cst_54 = arith.constant dense<0.000000e+00> : vector<64xf32>
    %106 = vector.multi_reduction <add>, %105, %cst_54 [1] : vector<64x64xf32> to vector<64xf32>
    %107 = vector.shape_cast %106 : vector<64xf32> to vector<64x1xf32>
    %108 = tpu.reciprocal %107 {approx = true} : vector<64x1xf32> -> vector<64x1xf32>
    %109 = vector.broadcast %108 : vector<64x1xf32> to vector<64x64xf32>
    %110 = arith.mulf %105, %109 : vector<64x64xf32>
    %111 = arith.truncf %110 : vector<64x64xf32> to vector<64x64xbf16>
    %cst_55 = arith.constant dense<0.000000e+00> : vector<64x128xf32>
    %112 = tpu.matmul %111, %96, %cst_55 {dimension_numbers = #tpu.dot_dimension_numbers<[1], [0], [0], [1], [0, 0, 1, 1], [], []>} : vector<64x64xbf16>, vector<64x128xbf16>, vector<64x128xf32> -> vector<64x128xf32>
    %113 = arith.truncf %112 : vector<64x128xf32> to vector<64x128xbf16>
    %c64_56 = arith.constant 64 : index
    %c0_57 = arith.constant 0 : index
    %114 = vector.load %arg15[%c64_56, %c0_57] : memref<192x384xf32, #tpu.memory_space<vmem>>, vector<64x128xf32>
    %115 = arith.truncf %114 : vector<64x128xf32> to vector<64x128xbf16>
    %c64_58 = arith.constant 64 : index
    %c128_59 = arith.constant 128 : index
    %116 = vector.load %arg15[%c64_58, %c128_59] : memref<192x384xf32, #tpu.memory_space<vmem>>, vector<64x128xf32>
    %117 = arith.truncf %116 : vector<64x128xf32> to vector<64x128xbf16>
    %cst_60 = arith.constant dense<0.000000e+00> : vector<64x64xf32>
    %118 = tpu.matmul %94, %117, %cst_60 {dimension_numbers = #tpu.dot_dimension_numbers<[1], [1], [0], [0], [0, 0, 1, 0], [], []>} : vector<64x128xbf16>, vector<64x128xbf16>, vector<64x64xf32> -> vector<64x64xf32>
    %119 = arith.addf %118, %92 : vector<64x64xf32>
    %cst_61 = arith.constant dense<0xFF800000> : vector<64xf32>
    %120 = vector.multi_reduction <maximumf>, %119, %cst_61 [1] : vector<64x64xf32> to vector<64xf32>
    %121 = vector.shape_cast %120 : vector<64xf32> to vector<64x1xf32>
    %122 = vector.broadcast %121 : vector<64x1xf32> to vector<64x64xf32>
    %123 = arith.subf %119, %122 : vector<64x64xf32>
    %124 = math.exp %123 : vector<64x64xf32>
    %cst_62 = arith.constant dense<0.000000e+00> : vector<64xf32>
    %125 = vector.multi_reduction <add>, %124, %cst_62 [1] : vector<64x64xf32> to vector<64xf32>
    %126 = vector.shape_cast %125 : vector<64xf32> to vector<64x1xf32>
    %127 = tpu.reciprocal %126 {approx = true} : vector<64x1xf32> -> vector<64x1xf32>
    %128 = vector.broadcast %127 : vector<64x1xf32> to vector<64x64xf32>
    %129 = arith.mulf %124, %128 : vector<64x64xf32>
    %130 = arith.truncf %129 : vector<64x64xf32> to vector<64x64xbf16>
    %cst_63 = arith.constant dense<0.000000e+00> : vector<64x128xf32>
    %131 = tpu.matmul %130, %115, %cst_63 {dimension_numbers = #tpu.dot_dimension_numbers<[1], [0], [0], [1], [0, 0, 1, 1], [], []>} : vector<64x64xbf16>, vector<64x128xbf16>, vector<64x128xf32> -> vector<64x128xf32>
    %132 = arith.truncf %131 : vector<64x128xf32> to vector<64x128xbf16>
    %c128_64 = arith.constant 128 : index
    %c0_65 = arith.constant 0 : index
    %133 = vector.load %arg15[%c128_64, %c0_65] : memref<192x384xf32, #tpu.memory_space<vmem>>, vector<64x128xf32>
    %134 = arith.truncf %133 : vector<64x128xf32> to vector<64x128xbf16>
    %c128_66 = arith.constant 128 : index
    %c128_67 = arith.constant 128 : index
    %135 = vector.load %arg15[%c128_66, %c128_67] : memref<192x384xf32, #tpu.memory_space<vmem>>, vector<64x128xf32>
    %136 = arith.truncf %135 : vector<64x128xf32> to vector<64x128xbf16>
    %cst_68 = arith.constant dense<0.000000e+00> : vector<64x64xf32>
    %137 = tpu.matmul %94, %136, %cst_68 {dimension_numbers = #tpu.dot_dimension_numbers<[1], [1], [0], [0], [0, 0, 1, 0], [], []>} : vector<64x128xbf16>, vector<64x128xbf16>, vector<64x64xf32> -> vector<64x64xf32>
    %138 = arith.addf %137, %92 : vector<64x64xf32>
    %cst_69 = arith.constant dense<0xFF800000> : vector<64xf32>
    %139 = vector.multi_reduction <maximumf>, %138, %cst_69 [1] : vector<64x64xf32> to vector<64xf32>
    %140 = vector.shape_cast %139 : vector<64xf32> to vector<64x1xf32>
    %141 = vector.broadcast %140 : vector<64x1xf32> to vector<64x64xf32>
    %142 = arith.subf %138, %141 : vector<64x64xf32>
    %143 = math.exp %142 : vector<64x64xf32>
    %cst_70 = arith.constant dense<0.000000e+00> : vector<64xf32>
    %144 = vector.multi_reduction <add>, %143, %cst_70 [1] : vector<64x64xf32> to vector<64xf32>
    %145 = vector.shape_cast %144 : vector<64xf32> to vector<64x1xf32>
    %146 = tpu.reciprocal %145 {approx = true} : vector<64x1xf32> -> vector<64x1xf32>
    %147 = vector.broadcast %146 : vector<64x1xf32> to vector<64x64xf32>
    %148 = arith.mulf %143, %147 : vector<64x64xf32>
    %149 = arith.truncf %148 : vector<64x64xf32> to vector<64x64xbf16>
    %cst_71 = arith.constant dense<0.000000e+00> : vector<64x128xf32>
    %150 = tpu.matmul %149, %134, %cst_71 {dimension_numbers = #tpu.dot_dimension_numbers<[1], [0], [0], [1], [0, 0, 1, 1], [], []>} : vector<64x64xbf16>, vector<64x128xbf16>, vector<64x128xf32> -> vector<64x128xf32>
    %151 = arith.truncf %150 : vector<64x128xf32> to vector<64x128xbf16>
    %152 = tpu.concatenate %113, %132, %151 in 1 : vector<64x128xbf16>, vector<64x128xbf16>, vector<64x128xbf16> -> vector<64x384xbf16>
    %c0_72 = arith.constant 0 : index
    %c0_73 = arith.constant 0 : index
    %153 = vector.load %arg8[%c0_72, %c0_73] : memref<384x128xbf16, #tpu.memory_space<vmem>>, vector<384x128xbf16>
    %cst_74 = arith.constant dense<0.000000e+00> : vector<64x128xf32>
    %154 = tpu.matmul %152, %153, %cst_74 {dimension_numbers = #tpu.dot_dimension_numbers<[1], [0], [0], [1], [0, 0, 1, 1], [], []>} : vector<64x384xbf16>, vector<384x128xbf16>, vector<64x128xf32> -> vector<64x128xf32>
    %155 = arith.truncf %93 : vector<64x128xf32> to vector<64x128xbf16>
    %c0_75 = arith.constant 0 : index
    %c0_76 = arith.constant 0 : index
    %156 = vector.load %arg11[%c0_75, %c0_76] : memref<128x256xbf16, #tpu.memory_space<vmem>>, vector<128x256xbf16>
    %cst_77 = arith.constant dense<0.000000e+00> : vector<64x256xf32>
    %157 = tpu.matmul %155, %156, %cst_77 {dimension_numbers = #tpu.dot_dimension_numbers<[1], [0], [0], [1], [0, 0, 1, 1], [], []>} : vector<64x128xbf16>, vector<128x256xbf16>, vector<64x256xf32> -> vector<64x256xf32>
    %cst_78 = arith.constant dense<0xFF800000> : vector<64xf32>
    %158 = vector.multi_reduction <maximumf>, %157, %cst_78 [1] : vector<64x256xf32> to vector<64xf32>
    %159 = vector.shape_cast %158 : vector<64xf32> to vector<64x1xf32>
    %160 = vector.broadcast %159 : vector<64x1xf32> to vector<64x256xf32>
    %161 = arith.subf %157, %160 : vector<64x256xf32>
    %162 = math.exp %161 : vector<64x256xf32>
    %cst_79 = arith.constant dense<0.000000e+00> : vector<64xf32>
    %163 = vector.multi_reduction <add>, %162, %cst_79 [1] : vector<64x256xf32> to vector<64xf32>
    %164 = vector.shape_cast %163 : vector<64xf32> to vector<64x1xf32>
    %165 = tpu.reciprocal %164 {approx = true} : vector<64x1xf32> -> vector<64x1xf32>
    %166 = vector.broadcast %165 : vector<64x1xf32> to vector<64x256xf32>
    %167 = arith.mulf %162, %166 : vector<64x256xf32>
    %168 = arith.truncf %167 : vector<64x256xf32> to vector<64x256xbf16>
    %c0_80 = arith.constant 0 : index
    %c0_81 = arith.constant 0 : index
    %169 = vector.load %arg12[%c0_80, %c0_81] : memref<256x128xbf16, #tpu.memory_space<vmem>>, vector<256x128xbf16>
    %cst_82 = arith.constant dense<0.000000e+00> : vector<64x128xf32>
    %170 = tpu.matmul %168, %169, %cst_82 {dimension_numbers = #tpu.dot_dimension_numbers<[1], [0], [0], [1], [0, 0, 1, 1], [], []>} : vector<64x256xbf16>, vector<256x128xbf16>, vector<64x128xf32> -> vector<64x128xf32>
    %171 = arith.subf %93, %170 : vector<64x128xf32>
    %172 = math.absf %171 : vector<64x128xf32>
    %cst_83 = arith.constant dense<0.000000e+00> : vector<64xf32>
    %173 = vector.multi_reduction <add>, %172, %cst_83 [1] : vector<64x128xf32> to vector<64xf32>
    %174 = vector.shape_cast %173 : vector<64xf32> to vector<64x1xf32>
    %cst_84 = arith.constant dense<0.000000e+00> : vector<1xf32>
    %175 = vector.multi_reduction <add>, %174, %cst_84 [0] : vector<64x1xf32> to vector<1xf32>
    %176 = vector.shape_cast %175 : vector<1xf32> to vector<1x1xf32>
    %c0_85 = arith.constant 0 : index
    %c0_86 = arith.constant 0 : index
    %c0_87 = arith.constant 0 : index
    %177 = vector.load %arg14[%c0_85, %c0_86, %c0_87] : memref<1x1x1xf32, #tpu.memory_space<vmem>>, vector<1x1x1xf32>
    %178 = vector.shape_cast %177 : vector<1x1x1xf32> to vector<1x1xf32>
    %179 = vector.shape_cast %176 : vector<1x1xf32> to vector<1x1x1xf32>
    tpu.vector_store %arg14[%c0_85, %c0_86, %c0_87], %179 {strides = array<i32>} : memref<1x1x1xf32, #tpu.memory_space<vmem>>, vector<1x1x1xf32>,
    %180 = arith.truncf %170 : vector<64x128xf32> to vector<64x128xbf16>
    %c0_88 = arith.constant 0 : index
    %c0_89 = arith.constant 0 : index
    %181 = vector.load %arg9[%c0_88, %c0_89] : memref<128x128xbf16, #tpu.memory_space<vmem>>, vector<128x128xbf16>
    %cst_90 = arith.constant dense<0.000000e+00> : vector<64x128xf32>
    %182 = tpu.matmul %180, %181, %cst_90 {dimension_numbers = #tpu.dot_dimension_numbers<[1], [0], [0], [1], [0, 0, 1, 1], [], []>} : vector<64x128xbf16>, vector<128x128xbf16>, vector<64x128xf32> -> vector<64x128xf32>
    %183 = arith.addf %154, %182 : vector<64x128xf32>
    %c0_91 = arith.constant 0 : index
    %c0_92 = arith.constant 0 : index
    %184 = vector.load %arg10[%c0_91, %c0_92] : memref<1x128xf32, #tpu.memory_space<vmem>>, vector<1x128xf32>
    %185 = vector.broadcast %184 : vector<1x128xf32> to vector<64x128xf32>
    %186 = arith.addf %183, %185 : vector<64x128xf32>
    %c0_93 = arith.constant 0 : index
    %c1_94 = arith.constant 1 : index
    %c0_95 = arith.constant 0 : index
    %c0_96 = arith.constant 0 : index
    %187 = vector.load %arg1[%c0_93, %c1_94, %c0_95, %c0_96] : memref<1x3x64x128xf32, #tpu.memory_space<vmem>>, vector<1x1x64x128xf32>
    %188 = vector.shape_cast %187 : vector<1x1x64x128xf32> to vector<64x128xf32>
    %189 = arith.addf %186, %188 : vector<64x128xf32>
    %c0_97 = arith.constant 0 : index
    %c0_98 = arith.constant 0 : index
    %c0_99 = arith.constant 0 : index
    %190 = vector.load %arg13[%c0_97, %c0_98, %c0_99] : memref<1x64x128xf32, #tpu.memory_space<vmem>>, vector<1x64x128xf32>
    %191 = vector.shape_cast %190 : vector<1x64x128xf32> to vector<64x128xf32>
    %192 = vector.shape_cast %189 : vector<64x128xf32> to vector<1x64x128xf32>
    tpu.vector_store %arg13[%c0_97, %c0_98, %c0_99], %192 {strides = array<i32>} : memref<1x64x128xf32, #tpu.memory_space<vmem>>, vector<1x64x128xf32>,
    return
  }
  func.func @transform_0(%arg0: i32) -> (i32, i32, i32, i32) {
    %c0_i32 = arith.constant 0 : i32
    %c0_i32_0 = arith.constant 0 : i32
    %c0_i32_1 = arith.constant 0 : i32
    %c0_i32_2 = arith.constant 0 : i32
    return %arg0, %c0_i32, %c0_i32_0, %c0_i32_1 : i32, i32, i32, i32
  }
  func.func @transform_1(%arg0: i32) -> (i32, i32) {
    %c0_i32 = arith.constant 0 : i32
    %c0_i32_0 = arith.constant 0 : i32
    %c0_i32_1 = arith.constant 0 : i32
    return %c0_i32, %c0_i32_0 : i32, i32
  }
  func.func @transform_2(%arg0: i32) -> (i32, i32) {
    %c0_i32 = arith.constant 0 : i32
    %c0_i32_0 = arith.constant 0 : i32
    %c0_i32_1 = arith.constant 0 : i32
    return %c0_i32, %c0_i32_0 : i32, i32
  }
  func.func @transform_3(%arg0: i32) -> (i32, i32) {
    %c0_i32 = arith.constant 0 : i32
    %c0_i32_0 = arith.constant 0 : i32
    %c0_i32_1 = arith.constant 0 : i32
    return %c0_i32, %c0_i32_0 : i32, i32
  }
  func.func @transform_4(%arg0: i32) -> (i32, i32) {
    %c0_i32 = arith.constant 0 : i32
    %c0_i32_0 = arith.constant 0 : i32
    %c0_i32_1 = arith.constant 0 : i32
    return %c0_i32, %c0_i32_0 : i32, i32
  }
  func.func @transform_5(%arg0: i32) -> (i32, i32) {
    %c0_i32 = arith.constant 0 : i32
    %c0_i32_0 = arith.constant 0 : i32
    %c0_i32_1 = arith.constant 0 : i32
    return %c0_i32, %c0_i32_0 : i32, i32
  }
  func.func @transform_6(%arg0: i32) -> (i32, i32) {
    %c0_i32 = arith.constant 0 : i32
    %c0_i32_0 = arith.constant 0 : i32
    %c0_i32_1 = arith.constant 0 : i32
    return %c0_i32, %c0_i32_0 : i32, i32
  }
  func.func @transform_7(%arg0: i32) -> (i32, i32) {
    %c0_i32 = arith.constant 0 : i32
    %c0_i32_0 = arith.constant 0 : i32
    %c0_i32_1 = arith.constant 0 : i32
    return %c0_i32, %c0_i32_0 : i32, i32
  }
  func.func @transform_8(%arg0: i32) -> (i32, i32) {
    %c0_i32 = arith.constant 0 : i32
    %c0_i32_0 = arith.constant 0 : i32
    %c0_i32_1 = arith.constant 0 : i32
    return %c0_i32, %c0_i32_0 : i32, i32
  }
  func.func @transform_9(%arg0: i32) -> (i32, i32) {
    %c0_i32 = arith.constant 0 : i32
    %c0_i32_0 = arith.constant 0 : i32
    %c0_i32_1 = arith.constant 0 : i32
    return %c0_i32, %c0_i32_0 : i32, i32
  }
  func.func @transform_10(%arg0: i32) -> (i32, i32) {
    %c0_i32 = arith.constant 0 : i32
    %c0_i32_0 = arith.constant 0 : i32
    %c0_i32_1 = arith.constant 0 : i32
    return %c0_i32, %c0_i32_0 : i32, i32
  }
  func.func @transform_11(%arg0: i32) -> (i32, i32) {
    %c0_i32 = arith.constant 0 : i32
    %c0_i32_0 = arith.constant 0 : i32
    %c0_i32_1 = arith.constant 0 : i32
    return %c0_i32, %c0_i32_0 : i32, i32
  }
  func.func @transform_12(%arg0: i32) -> (i32, i32, i32) {
    %c0_i32 = arith.constant 0 : i32
    %c0_i32_0 = arith.constant 0 : i32
    %c0_i32_1 = arith.constant 0 : i32
    return %arg0, %c0_i32, %c0_i32_0 : i32, i32, i32
  }
  func.func @transform_13(%arg0: i32) -> (i32, i32, i32) {
    %c0_i32 = arith.constant 0 : i32
    %c0_i32_0 = arith.constant 0 : i32
    %c0_i32_1 = arith.constant 0 : i32
    return %arg0, %c0_i32, %c0_i32_0 : i32, i32, i32
  }
}

</mosaic_0001>

<bundles_post_ra>
// kernel: stna_forward.1
= control target key start
LH: loop header
LB: loop body
LE: loop exit
PB: predicated region body
PF: predicated region fallthrough
CT: control target
= control target key end

     0   :  { %s5792_s0 = inlined_call_operand.vmem [shape: f32[2,3,64,128], index: 0, kind: input, shape index: {}]   ;;  %s5793_s1 = inlined_call_operand.vmem [shape: f32[128,128], index: 1, kind: input, shape index: {}]   ;;  %s5794_s2 = inlined_call_operand.vmem [shape: f32[1,128], index: 2, kind: input, shape index: {}]   ;;  %s5795_s3 = inlined_call_operand.vmem [shape: f32[1,128], index: 3, kind: input, shape index: {}]   ;;  %s5796_s4 = inlined_call_operand.vmem [shape: f32[64,64], index: 4, kind: input, shape index: {}]   ;;  %s5797_s5 = inlined_call_operand.vmem [shape: bf16[128,384], index: 5, kind: input, shape index: {}]   ;;  %s5798_s6 = inlined_call_operand.vmem [shape: f32[1,384], index: 6, kind: input, shape index: {}]   ;;  %s5799_s7 = inlined_call_operand.vmem [shape: bf16[384,128], index: 7, kind: input, shape index: {}]   ;;  %s5800_s8 = inlined_call_operand.vmem [shape: bf16[128,128], index: 8, kind: input, shape index: {}]   ;;  %s5801_s9 = inlined_call_operand.vmem [shape: f32[1,128], index: 9, kind: input, shape index: {}]   ;;  %s5802_s10 = inlined_call_operand.vmem [shape: bf16[128,256], index: 10, kind: input, shape index: {}]   ;;  %s5803_s11 = inlined_call_operand.vmem [shape: bf16[256,128], index: 11, kind: input, shape index: {}]   ;;  %s5804_s12 = inlined_call_operand.hbm [shape: f32[2,64,128], index: 12, kind: output, shape index: {0}]   ;;  %s5805_s13 = inlined_call_operand.vmem [shape: f32[2,1,1], index: 13, kind: output, shape index: {1}]  }
   0x1   :  { %5809 = sst [smem:[#allocation9_spill]] %s5792_s0 }
   0x2   :  { %19 = vsyncpa [#allocation4], 0 }
   0x3   :  { %21 = vsyncpa [#allocation4 + $0x1], 0  ;;  %s4271_s25 = smov 0   ;;  %s4273_s26 = smov 0  }
   0x4   :  { %s4275_s27 = smov 0   ;;  %s4277_s28 = smov 0  }
   0x5 LB: > { %5810 = sst [smem:[#allocation6_spill]] %s4189_s27  ;;  %s4292_s29 = sadd.s32 4294967295, %s4193_s28   ;;  %s4193_s28 = sphi %s4277_s28, %s5828_s28   ;;  %s4189_s27 = sphi %s4275_s27, %s5830_s27   ;;  %s4185_s26 = sphi %s4273_s26, %s5832_s26   ;;  %s4181_s25 = sphi %s4271_s25, %s5831_s25  }
   0x6   : > { %s3275_s30 = sadd.s32 4294967294, %s4193_s28   ;;  %s4296_s14 = sadd.s32 1, %s4193_s28  }
   0x7   : > { %5811 = sst [smem:[#allocation7_spill]] %s4296_s14  ;;  %s291_s15 = sadd.s32 1, %s4189_s27 }
   0x8   : > { %s288_s16 = ssub.s32 %s4193_s28, %s4296_s14  ;;  %p301_p0 = scmp.ne.s32.totalorder %s4189_s27, %s4185_s26 }
   0x9   : > { %p289_p1 = scmp.eq.s32.totalorder %s288_s16, 0  ;;  %p302_p2 = scmp.eq.s32.totalorder %s4292_s29, 1 }
   0xa   : > { %p307_p3 = scmp.ne.s32.totalorder %s4185_s26, %s4181_s25  ;;  %p308_p4 = scmp.eq.s32.totalorder %s3275_s30, 1 }
   0xb   : > { %s4307_s17 = scalar_select %p289_p1, %s4189_s27, %s291_s15  }
   0xc   : > { %p4309_p5 = por %p302_p2, %p301_p0  ;;  %p4313_p6 = por %p308_p4, %p307_p3 }
   0xd   : > { %5812 = sst [smem:[#allocation8_spill]] %s4307_s17  ;;  %p3278_p7 = scmp.ge.s32.totalorder %s4193_s28, 1 }
   0xe   : > { %p393_p8 = scmp.lt.s32.totalorder %s4193_s28, 3 }
  0x10   : > { %p394_p9 = pnand %p3278_p7, %p393_p8 }
  0x11   : > { %p440_p10 = scmp.lt.s32.totalorder (!%p394_p9), %s4292_s29, 1  ;;  %s5815_s0 = sld [smem:[#allocation9_spill]] (!%p394_p9) }
  0x12   : > { %397 = sbr.rel (%p394_p9) target bundleno = 2149 (0x865), region = 68  ;;  %s3413_s27 = sshll.u32 (!%p394_p9), %s4292_s29, 10 }
  0x13   : > { %s5744_s15 = scalar_lea.hbm (!%p394_p9), %s5804_s12, %s3413_s27 }
  0x17   : > { %v604_v0 = vld [vmem:[%s5793_s1 + $0x78] sm:$0xff]  ;;  %v4195_v1 = vmov 0.0   ;;  %v603_v2 = vld [vmem:[%s5793_s1 + $0x70] sm:$0xff]  ;;  %vm4196_vm0 = vmmov 0   ;;  %s4329_s24 = scalar_select %p440_p10, %s4292_s29, 1  ;;  %v602_v3 = vld [vmem:[%s5793_s1 + $0x68] sm:$0xff] }
  0x18   : > { %3603 = vmatprep.subr.mxu0 %v4195_v1  ;;  %3635 = vmatprep.mubr.msk.f32.mxu0 %vm4196_vm0, %v4195_v1  ;;  %v601_v4 = vld [vmem:[%s5793_s1 + $0x60] sm:$0xff]  ;;  %v600_v5 = vld [vmem:[%s5793_s1 + $0x58] sm:$0xff]  ;;  %v599_v9 = vld [vmem:[%s5793_s1 + $0x50] sm:$0xff]  ;;  %vm579_vm1 = vcmask 1040384   ;;  %vm581_vm2 = vcmask 1041408   ;;  %vm583_vm3 = vcmask 1042432  }
  0x19   : > { %3604 = vmatpush3.msra.mxu0 %v604_v0  ;;  %s3838_s16 = smul.u32 192, %s4329_s24  ;;  %v598_v25 = vld [vmem:[%s5793_s1 + $0x48] sm:$0xff]  ;;  %v597_v26 = vld [vmem:[%s5793_s1 + $0x40] sm:$0xff]  ;;  %v596_v37 = vld [vmem:[%s5793_s1 + $0x38] sm:$0xff]  ;;  %vm585_vm4 = vcmask 1043456   ;;  %vm587_vm5 = vcmask 1044480  }
  0x1a   : > { %3605 = vmatprep.subr.mxu0 %v4195_v1  ;;  %v595_v51 = vld [vmem:[%s5793_s1 + $0x30] sm:$0xff]  ;;  %v594_v62 = vld [vmem:[%s5793_s1 + $0x28] sm:$0xff]  ;;  %vm1445_vm6 = vcmask 523264   ;;  %vm2726_vm7 = vcmask 0  }
  0x1b   : > { %3606 = vmatpush3.msra.mxu0 %v603_v2  ;;  %s4346_s14 = scalar_lea.vmem %s5815_s0, %s3838_s16  ;;  %s447_s16 = scalar_lea.vmem %s5805_s13, %s4329_s24 }
  0x1c   : > { %3607 = vmatprep.subr.mxu0 %v4195_v1  ;;  %v4350_v6 = vld [vmem:[%s4346_s14] sm:$0xff]  ;;  %v4353_v7 = vld [vmem:[%s4346_s14 + $0x8] sm:$0xff]  ;;  %v4356_v8 = vld [vmem:[%s4346_s14 + $0x10] sm:$0xff]  ;;  %s432_s24 = sand.u32 1, %s4185_s26  }
  0x1d   : > { %3608 = vmatpush3.msra.mxu0 %v602_v3  ;;  %v4362_v10 = vld [vmem:[%s4346_s14 + $0x18] sm:$0xff]  ;;  %v4365_v11 = vld [vmem:[%s4346_s14 + $0x20] sm:$0xff]  ;;  %v459_v12 = vadd.f32 %v4353_v7, %v4350_v6  ;;  %v472_v13 = vmul.f32 %v4350_v6, %v4350_v6  ;;  %v473_v14 = vmul.f32 %v4353_v7, %v4353_v7  ;;  %v474_v15 = vmul.f32 %v4356_v8, %v4356_v8  ;;  %v4377_v16 = vld [vmem:[%s4346_s14 + $0x28] sm:$0xff]  ;;  %s3279_s22 = sshll.u32 %s432_s24, 6  ;;  %s5752_s29 = scalar_lea.sflag [#allocation4], %s432_s24 }
  0x1e   : > { %3609 = vmatprep.subr.mxu0 %v4195_v1  ;;  %v4380_v17 = vld [vmem:[%s4346_s14 + $0x30] sm:$0xff]  ;;  %v4383_v18 = vld [vmem:[%s4346_s14 + $0x40] sm:$0xff]  ;;  %v475_v20 = vmul.f32 %v4362_v10, %v4362_v10  ;;  %v4389_v22 = vld [vmem:[%s4346_s14 + $0x48] sm:$0xff]  ;;  %v476_v31 = vmul.f32 %v4365_v11, %v4365_v11  ;;  %v477_v39 = vmul.f32 %v4377_v16, %v4377_v16  ;;  %s5714_s23 = scalar_lea.vmem [#allocation3], %s3279_s22 }
  0x1f   : > { %3610 = vmatpush3.msra.mxu0 %v601_v4  ;;  %v460_v19 = vadd.f32 %v459_v12, %v4356_v8  ;;  %v480_v21 = vadd.f32 %v473_v14, %v472_v13  ;;  %v4392_v23 = vld [vmem:[%s4346_s14 + $0x50] sm:$0xff]  ;;  %v4395_v24 = vld [vmem:[%s4346_s14 + $0x58] sm:$0xff]  ;;  %v502_v27 = vadd.f32 %v4389_v22, %v4383_v18  ;;  %v515_v28 = vmul.f32 %v4383_v18, %v4383_v18  ;;  %v4414_v33 = vld [vmem:[%s4346_s14 + $0x60] sm:$0xff]  ;;  %s3191_s17 = sshll.u32 %s5714_s23, 4  ;;  %s5746_s17 = int_to_ptr.vmem [resolvable:$true] %s3191_s17 }
  0x20   : > { %3611 = vmatprep.subr.mxu0 %v4195_v1  ;;  %v516_v29 = vmul.f32 %v4389_v22, %v4389_v22  ;;  %v517_v34 = vmul.f32 %v4392_v23, %v4392_v23  ;;  %v4419_v35 = vld [vmem:[%s4346_s14 + $0x80] sm:$0xff]  ;;  %v4422_v36 = vld [vmem:[%s4346_s14 + $0x88] sm:$0xff]  ;;  %v4429_v38 = vld [vmem:[%s4346_s14 + $0x38] sm:$0xff]  ;;  %v478_v40 = vmul.f32 %v4380_v17, %v4380_v17  ;;  %v518_v42 = vmul.f32 %v4395_v24, %v4395_v24 }
  0x21   : > { %3612 = vmatpush3.msra.mxu0 %v600_v5  ;;  %v461_v30 = vadd.f32 %v460_v19, %v4362_v10  ;;  %v481_v32 = vadd.f32 %v480_v21, %v474_v15  ;;  %v503_v41 = vadd.f32 %v4392_v23, %v502_v27  ;;  %v4439_v43 = vld [vmem:[%s4346_s14 + $0x90] sm:$0xff]  ;;  %v4443_v46 = vld [vmem:[%s4346_s14 + $0x68] sm:$0xff]  ;;  %v4449_v49 = vld [vmem:[%s4346_s14 + $0x98] sm:$0xff]  ;;  %v545_v50 = vadd.f32 %v4422_v36, %v4419_v35 }
  0x22   : > { %3613 = vmatprep.subr.mxu0 %v4195_v1  ;;  %v4446_v47 = vld [vmem:[%s4346_s14 + $0x70] sm:$0xff]  ;;  %v523_v48 = vadd.f32 %v516_v29, %v515_v28  ;;  %v519_v53 = vmul.f32 %v4414_v33, %v4414_v33  ;;  %v4461_v54 = vld [vmem:[%s4346_s14 + $0xa0] sm:$0xff]  ;;  %v558_v55 = vmul.f32 %v4419_v35, %v4419_v35  ;;  %v559_v56 = vmul.f32 %v4422_v36, %v4422_v36  ;;  %v4469_v59 = vld [vmem:[%s4346_s14 + $0x78] sm:$0xff] }
  0x23   : > { %3614 = vmatpush3.msra.mxu0 %v599_v9  ;;  %v462_v44 = vadd.f32 %v461_v30, %v4365_v11  ;;  %v482_v45 = vadd.f32 %v481_v32, %v475_v20  ;;  %v504_v52 = vadd.f32 %v4395_v24, %v503_v41  ;;  %v546_v61 = vadd.f32 %v4439_v43, %v545_v50  ;;  %v4482_v3 = vld [vmem:[%s4346_s14 + $0xa8] sm:$0xff]  ;;  %v593_v14 = vld [vmem:[%s5793_s1 + $0x20] sm:$0xff]  ;;  %v4496_v20 = vld [vmem:[%s4346_s14 + $0xb0] sm:$0xff] }
  0x24   : > { %3615 = vmatprep.subr.mxu0 %v4195_v1  ;;  %v524_v60 = vadd.f32 %v523_v48, %v517_v34  ;;  %v479_v63 = vmul.f32 %v4429_v38, %v4429_v38  ;;  %v520_v2 = vmul.f32 %v4443_v46, %v4443_v46  ;;  %v560_v4 = vmul.f32 %v4439_v43, %v4439_v43  ;;  %v592_v30 = vld [vmem:[%s5793_s1 + $0x18] sm:$0xff] }
  0x25   : > { %3616 = vmatpush3.msra.mxu0 %v598_v25  ;;  %v463_v57 = vadd.f32 %v462_v44, %v4377_v16  ;;  %v483_v58 = vadd.f32 %v482_v45, %v476_v31  ;;  %v505_v0 = vadd.f32 %v4414_v33, %v504_v52  ;;  %v547_v13 = vadd.f32 %v4449_v49, %v546_v61  ;;  %v4510_v34 = vld [vmem:[%s4346_s14 + $0xb8] sm:$0xff]  ;;  %v591_v45 = vld [vmem:[%s5793_s1 + $0x10] sm:$0xff] }
  0x26   : > { %3617 = vmatprep.subr.mxu0 %v4195_v1  ;;  %v525_v12 = vadd.f32 %v524_v60, %v518_v42  ;;  %v521_v19 = vmul.f32 %v4446_v47, %v4446_v47  ;;  %v561_v21 = vmul.f32 %v4449_v49, %v4449_v49  ;;  %v566_v25 = vadd.f32 %v559_v56, %v558_v55 }
  0x27   : > { %3618 = vmatpush3.msra.mxu0 %v597_v26  ;;  %v464_v5 = vadd.f32 %v463_v57, %v4380_v17  ;;  %v484_v9 = vadd.f32 %v483_v58, %v477_v39  ;;  %v506_v15 = vadd.f32 %v4443_v46, %v505_v0  ;;  %v548_v29 = vadd.f32 %v4461_v54, %v547_v13  ;;  %v590_v57 = vld [vmem:[%s5793_s1 + $0x8] sm:$0xff] }
  0x28   : > { %3619 = vmatprep.subr.mxu0 %v4195_v1  ;;  %v526_v28 = vadd.f32 %v525_v12, %v519_v53  ;;  %v522_v32 = vmul.f32 %v4469_v59, %v4469_v59  ;;  %v567_v39 = vadd.f32 %v566_v25, %v560_v4  ;;  %v563_v50 = vmul.f32 %v4482_v3, %v4482_v3  ;;  %v589_v4 = vld [vmem:[%s5793_s1] sm:$0xff] }
  0x29   : > { %3620 = vmatpush3.msra.mxu0 %v596_v37  ;;  %v465_v26 = vadd.f32 %v464_v5, %v4429_v38  ;;  %v485_v27 = vadd.f32 %v484_v9, %v478_v40  ;;  %v507_v31 = vadd.f32 %v4446_v47, %v506_v15  ;;  %v562_v37 = vmul.f32 %v4461_v54, %v4461_v54 }
  0x2a   : > { %3621 = vmatprep.subr.mxu0 %v4195_v1  ;;  %v527_v42 = vadd.f32 %v526_v28, %v520_v2  ;;  %v549_v44 = vadd.f32 %v4482_v3, %v548_v29  ;;  %v564_v60 = vmul.f32 %v4496_v20, %v4496_v20  ;;  %v565_v9 = vmul.f32 %v4510_v34, %v4510_v34 }
  0x2b   : > { %3622 = vmatpush3.msra.mxu0 %v595_v51  ;;  %v466_v40 = vrot.slane %v465_v26, 4  ;;  %v486_v41 = vadd.f32 %v485_v27, %v479_v63  ;;  %v508_v48 = vadd.f32 %v4469_v59, %v507_v31  ;;  %v568_v51 = vadd.f32 %v567_v39, %v561_v21 }
  0x2c   : > { %3623 = vmatprep.subr.mxu0 %v4195_v1  ;;  %v528_v55 = vadd.f32 %v527_v42, %v521_v19  ;;  %v550_v56 = vadd.f32 %v4496_v20, %v549_v44 }
  0x2d   : > { %3624 = vmatpush3.msra.mxu0 %v594_v62  ;;  %v467_v52 = vadd.f32 %v466_v40, %v465_v26  ;;  %v487_v53 = vrot.slane %v486_v41, 4  ;;  %v509_v58 = vrot.slane %v508_v48, 4  ;;  %v569_v61 = vadd.f32 %v568_v51, %v562_v37 }
  0x2e   : > { %3625 = vmatprep.subr.mxu0 %v4195_v1  ;;  %v529_v0 = vadd.f32 %v528_v55, %v522_v32  ;;  %v551_v2 = vadd.f32 %v4510_v34, %v550_v56 }
  0x2f   : > { %3626 = vmatpush3.msra.mxu0 %v593_v14  ;;  %v468_v62 = vrot.slane %v467_v52, 2  ;;  %v488_v63 = vadd.f32 %v487_v53, %v486_v41  ;;  %v510_v5 = vadd.f32 %v509_v58, %v508_v48  ;;  %v570_v12 = vadd.f32 %v569_v61, %v563_v50 }
  0x30   : > { %3627 = vmatprep.subr.mxu0 %v4195_v1  ;;  %v530_v15 = vrot.slane %v529_v0, 4  ;;  %v552_v19 = vrot.slane %v551_v2, 4 }
  0x31   : > { %3628 = vmatpush3.msra.mxu0 %v592_v30  ;;  %v469_v13 = vadd.f32 %v468_v62, %v467_v52  ;;  %v489_v14 = vrot.slane %v488_v63, 2  ;;  %v511_v21 = vrot.slane %v510_v5, 2  ;;  %v571_v25 = vadd.f32 %v570_v12, %v564_v60  ;;  %v3887_v12 = vld [vmem:[%s5797_s5 + $0x94] ss:$12 sps:$4 sm:$0xff]  }
  0x32   : > { %3629 = vmatprep.subr.mxu0 %v4195_v1  ;;  %v531_v28 = vadd.f32 %v530_v15, %v529_v0  ;;  %v553_v29 = vadd.f32 %v552_v19, %v551_v2  ;;  %v3891_v15 = vld [vmem:[%s5797_s5 + $0x7c] ss:$12 sps:$4 sm:$0xff]   ;;  %v3893_v19 = vld [vmem:[%s5797_s5 + $0x78] ss:$12 sps:$4 sm:$0xff]  }
  0x33   : > { %3630 = vmatpush3.msra.mxu0 %v591_v45  ;;  %v470_v26 = vrot.slane %v469_v13, 1  ;;  %v490_v27 = vadd.f32 %v489_v14, %v488_v63  ;;  %v512_v30 = vadd.f32 %v511_v21, %v510_v5  ;;  %v572_v31 = vadd.f32 %v571_v25, %v565_v9  ;;  %v3885_v5 = vld [vmem:[%s5797_s5 + $0xa8] ss:$12 sps:$4 sm:$0xff]   ;;  %v3886_v9 = vld [vmem:[%s5797_s5 + $0xb0] ss:$12 sps:$4 sm:$0xff]  }
  0x34   : > { %3631 = vmatprep.subr.mxu0 %v4195_v1  ;;  %v532_v39 = vrot.slane %v531_v28, 2  ;;  %v554_v40 = vrot.slane %v553_v29, 2  ;;  %v3890_v14 = vld [vmem:[%s5797_s5 + $0x98] ss:$12 sps:$4 sm:$0xff]   ;;  %v3894_v21 = vld [vmem:[%s5797_s5 + $0x80] ss:$12 sps:$4 sm:$0xff]  }
  0x35   : > { %3632 = vmatpush3.msra.mxu0 %v590_v57  ;;  %v471_v32 = vadd.f32 %v470_v26, %v469_v13  ;;  %v491_v37 = vrot.slane %v490_v27, 1  ;;  %v513_v41 = vrot.slane %v512_v30, 1  ;;  %v573_v42 = vrot.slane %v572_v31, 4  ;;  %v3889_v13 = vld [vmem:[%s5797_s5 + $0x90] ss:$12 sps:$4 sm:$0xff]  }
  0x36   : > { %3633 = vmatprep.subr.mxu0 %v4195_v1  ;;  %v533_v45 = vadd.f32 %v532_v39, %v531_v28  ;;  %v555_v48 = vadd.f32 %v554_v40, %v553_v29  ;;  %v3895_v25 = vld [vmem:[%s5797_s5 + $0x64] ss:$12 sps:$4 sm:$0xff]   ;;  %v3897_v26 = vld [vmem:[%s5797_s5 + $0x60] ss:$12 sps:$4 sm:$0xff]   ;;  %v3901_v29 = vld [vmem:[%s5797_s5 + $0x48] ss:$12 sps:$4 sm:$0xff]  }
  0x37   : > { %3634 = vmatpush3.msra.mxu0 %v589_v4  ;;  %v492_v44 = vadd.f32 %v491_v37, %v490_v27  ;;  %v514_v50 = vadd.f32 %v513_v41, %v512_v30  ;;  %v574_v51 = vadd.f32 %v573_v42, %v572_v31  ;;  %v3883_v4 = vld [vmem:[%s5797_s5 + $0xac] ss:$12 sps:$4 sm:$0xff]   ;;  %v3898_v27 = vld [vmem:[%s5797_s5 + $0x68] ss:$12 sps:$4 sm:$0xff]   ;;  %v3902_v30 = vld [vmem:[%s5797_s5 + $0x50] ss:$12 sps:$4 sm:$0xff]  }
  0x38   : > { %v534_v52 = vrot.slane %v533_v45, 1  ;;  %v556_v53 = vrot.slane %v555_v48, 1  ;;  %982 = vmatprep.subr.bf16.mxu1 %v3883_v4  ;;  %3638 = vmatprep.subr.bf16.mxu0 %v3886_v9  ;;  %v3899_v28 = vld [vmem:[%s5797_s5 + $0x4c] ss:$12 sps:$4 sm:$0xff]   ;;  %v3903_v31 = vld [vmem:[%s5797_s5 + $0x34] ss:$12 sps:$4 sm:$0xff]  }
  0x39   : > { %v580_v55 = vsel %vm579_vm1, %v471_v32, %v492_v44  ;;  %v575_v56 = vrot.slane %v574_v51, 2  ;;  %983 = vmatpush1.bf16.msra.mxu1 %v3885_v5  ;;  %v3905_v32 = vld [vmem:[%s5797_s5 + $0x30] ss:$12 sps:$4 sm:$0xff]   ;;  %v3906_v37 = vld [vmem:[%s5797_s5 + $0x38] ss:$12 sps:$4 sm:$0xff]  }
  0x3a   : > { %v582_v1 = vsel %vm581_vm2, %v580_v55, %v514_v50  ;;  %v535_v57 = vadd.f32 %v534_v52, %v533_v45  ;;  %v557_v58 = vadd.f32 %v556_v53, %v555_v48  ;;  %984 = vmatprep.subr.bf16.mxu1 %v3887_v12  ;;  %v3907_v39 = vld [vmem:[%s5797_s5 + $0x1c] ss:$12 sps:$4 sm:$0xff]   ;;  %v3909_v40 = vld [vmem:[%s5797_s5 + $0x18] ss:$12 sps:$4 sm:$0xff]   ;;  %v3910_v41 = vld [vmem:[%s5797_s5 + $0x20] ss:$12 sps:$4 sm:$0xff]  }
  0x3b   : > { %v576_v60 = vadd.f32 %v575_v56, %v574_v51  ;;  %v3911_v42 = vld [vmem:[%s5797_s5 + $0x4] ss:$12 sps:$4 sm:$0xff]   ;;  %v3913_v44 = vld [vmem:[%s5797_s5] ss:$12 sps:$4 sm:$0xff]   ;;  %v3914_v45 = vld [vmem:[%s5797_s5 + $0x8] ss:$12 sps:$4 sm:$0xff]  }
  0x3c   : > { %v584_v61 = vsel %vm583_vm3, %v582_v1, %v535_v57  ;;  %v4197_v48 = vmov 0  }
  0x3d   : > { %v577_v62 = vrot.slane %v576_v60, 1  ;;  %v586_v63 = vsel %vm585_vm4, %v584_v61, %v557_v58  ;;  %985 = vmatpush1.bf16.msra.mxu1 %v3889_v13  ;;  %1014 = vmatprep.mubr.bf16.mxu1 %v4197_v48  ;;  %v684_v58 = vlaneseq }
  0x3e   : > { %986 = vmatprep.subr.bf16.mxu1 %v3891_v15 }
  0x3f   : > { %v578_v0 = vadd.f32 %v577_v62, %v576_v60  ;;  %v4619_v60 = vshrl.u32 %v684_v58, 7  ;;  %v3297_v62 = vld [vmem:[%s5794_s2] ss:$0 sm:$0xff] }
  0x41   : > { %v588_v2 = vsel %vm587_vm5, %v586_v63, %v578_v0  ;;  %987 = vmatpush1.bf16.msra.mxu1 %v3893_v19  ;;  %v686_v61 = vsub.s32 0, %v4619_v60  ;;  %v705_v0 = vsub.s32 1, %v4619_v60  ;;  %v735_v4 = vsub.s32 2, %v4619_v60 }
  0x42   : > { %3636 = vmatmul.mubr.f32.vlgmr.msra.gmra.mxu0 %v588_v2  ;;  %988 = vmatprep.subr.bf16.mxu1 %v3895_v25  ;;  %v4648_v25 = vld [vmem:[%s5795_s3] ss:$0 sm:$0xff] }
  0x43   : > { %3639 = vmatpush3.bf16.msra.mxu0 %v3886_v9  ;;  %v747_v9 = vsub.s32 3, %v4619_v60 }
  0x44   : > { %3640 = vmatprep.subr.bf16.mxu0 %v3890_v14 }
  0x45   : > { %989 = vmatpush1.bf16.msra.mxu1 %v3897_v26 }
  0x46   : > { %990 = vmatprep.subr.bf16.mxu1 %v3899_v28 }
  0x47   : > { %3641 = vmatpush3.bf16.msra.mxu0 %v3890_v14 }
  0x48   : > { %3642 = vmatprep.subr.bf16.mxu0 %v3894_v21 }
  0x49   : > { %991 = vmatpush1.bf16.msra.mxu1 %v3901_v29 }
  0x4a   : > { %992 = vmatprep.subr.bf16.mxu1 %v3903_v31 }
  0x4b   : > { %3643 = vmatpush3.bf16.msra.mxu0 %v3894_v21 }
  0x4c   : > { %3644 = vmatprep.subr.bf16.mxu0 %v3898_v27 }
  0x4d   : > { %993 = vmatpush1.bf16.msra.mxu1 %v3905_v32 }
  0x4e   : > { %994 = vmatprep.subr.bf16.mxu1 %v3907_v39 }
  0x4f   : > { %3645 = vmatpush3.bf16.msra.mxu0 %v3898_v27 }
  0x50   : > { %3646 = vmatprep.subr.bf16.mxu0 %v3902_v30 }
  0x51   : > { %995 = vmatpush1.bf16.msra.mxu1 %v3909_v40 }
  0x52   : > { %996 = vmatprep.subr.bf16.mxu1 %v3911_v42 }
  0x53   : > { %3647 = vmatpush3.bf16.msra.mxu0 %v3902_v30 }
  0x54   : > { %3648 = vmatprep.subr.bf16.mxu0 %v3906_v37 }
  0x55   : > { %997 = vmatpush1.bf16.msra.mxu1 %v3913_v44 }
  0x57   : > { %3649 = vmatpush3.bf16.msra.mxu0 %v3906_v37 }
  0x58   : > { %3650 = vmatprep.subr.bf16.mxu0 %v3910_v41 }
  0x5b   : > { %3651 = vmatpush3.bf16.msra.mxu0 %v3910_v41 }
  0x5c   : > { %3652 = vmatprep.subr.bf16.mxu0 %v3914_v45 }
  0x5f   : > { %3653 = vmatpush3.bf16.msra.mxu0 %v3914_v45 }
 0x102   : > { %v671_v50 = vpop.f32.mrf.mxu0 }
 0x103   : > { %v4614_v51 = vmul.f32 0.00390625, %v671_v50 }
 0x104   : > { %v3637_v52 = vpop.f32.mrf.mxu0 }
 0x105   : > { %v676_v53 = vmul.f32 %v4614_v51, %v4614_v51  ;;  %v687_v63 = vrot.slane %v4614_v51, %v686_v61  ;;  %v4643_v21 = vrot.slane %v4614_v51, %v735_v4 }
 0x107   : > { %v678_v55 = vrot.slane %v676_v53, 7  ;;  %v688_v12 = vsub.f32 %v4350_v6, %v687_v63  ;;  %v689_v14 = vsub.f32 %v4353_v7, %v687_v63  ;;  %v690_v15 = vsub.f32 %v4356_v8, %v687_v63 }
 0x108   : > { %v691_v19 = vsub.f32 %v4362_v10, %v687_v63  ;;  %v692_v6 = vsub.f32 %v4365_v11, %v687_v63  ;;  %v693_v26 = vsub.f32 %v4377_v16, %v687_v63  ;;  %v694_v40 = vsub.f32 %v4380_v17, %v687_v63 }
 0x109   : > { %v680_v56 = vsub.f32 %v4614_v51, %v678_v55  ;;  %v695_v41 = vsub.f32 %v4429_v38, %v687_v63  ;;  %v737_v45 = vsub.f32 %v4383_v18, %v4643_v21  ;;  %v738_v50 = vsub.f32 %v4389_v22, %v4643_v21 }
 0x10a   : > { %v739_v22 = vsub.f32 %v4392_v23, %v4643_v21  ;;  %v740_v58 = vsub.f32 %v4395_v24, %v4643_v21  ;;  %v741_v63 = vsub.f32 %v4414_v33, %v4643_v21 }
 0x10b   : > { %v681_v1 = vmax.f32 %v680_v56, 0.0 }
 0x10d   : > { %v682_v57 = vadd.f32 1e-06, %v681_v1 }
 0x10f   : > { %3987 = vrsqrt.f32 %v682_v57 }
 0x11c   : > { %v3988_v2 = vpop.eup %3987 }
 0x11d   : > { %v4630_v5 = vmul.f32 %v3988_v2, %v3297_v62  ;;  %v771_v62 = vsub.s32 4, %v4619_v60  ;;  %v742_v2 = vsub.f32 %v4443_v46, %v4643_v21 }
 0x11f   : > { %v706_v13 = vrot.slane %v4630_v5, %v705_v0  ;;  %v748_v10 = vrot.slane %v4630_v5, %v747_v9  ;;  %v772_v24 = vrot.slane %v4614_v51, %v771_v62 }
 0x121   : > { %v707_v27 = vmul.f32 %v706_v13, %v688_v12  ;;  %v708_v7 = vmul.f32 %v706_v13, %v689_v14  ;;  %v709_v28 = vmul.f32 %v706_v13, %v690_v15  ;;  %v710_v8 = vmul.f32 %v706_v13, %v691_v19 }
 0x122   : > { %v711_v29 = vmul.f32 %v706_v13, %v692_v6  ;;  %v712_v30 = vmul.f32 %v706_v13, %v693_v26  ;;  %v713_v52 = vmul.f32 %v706_v13, %v694_v40  ;;  %v714_v53 = vmul.f32 %v706_v13, %v695_v41 }
 0x123   : > { %v721_v31 = vadd.f32 %v4648_v25, %v707_v27  ;;  %v722_v32 = vadd.f32 %v4648_v25, %v708_v7  ;;  %v723_v37 = vadd.f32 %v4648_v25, %v709_v28  ;;  %v724_v39 = vadd.f32 %v4648_v25, %v710_v8 }
 0x124   : > { %v725_v11 = vadd.f32 %v4648_v25, %v711_v29  ;;  %v726_v16 = vadd.f32 %v4648_v25, %v712_v30  ;;  %v749_v56 = vmul.f32 %v748_v10, %v737_v45  ;;  %v750_v1 = vmul.f32 %v748_v10, %v738_v50 }
 0x125   : > { %v729_v42 = vpack.c.bf16 %v722_v32, %v721_v31  ;;  %v730_v44 = vpack.c.bf16 %v724_v39, %v723_v37  ;;  %v727_v17 = vadd.f32 %v4648_v25, %v713_v52  ;;  %v728_v38 = vadd.f32 %v4648_v25, %v714_v53 }
 0x126   : > { %v731_v55 = vpack.c.bf16 %v726_v16, %v725_v11  ;;  %v757_v18 = vadd.f32 %v4648_v25, %v749_v56  ;;  %v758_v57 = vadd.f32 %v4648_v25, %v750_v1  ;;  %v751_v12 = vmul.f32 %v748_v10, %v739_v22 }
 0x127   : > { %1015 = vmatmul.mubr.bf16.vlgmr.msra.gmra.mxu1 %v729_v42  ;;  %3654 = vmatprep.mubr.bf16.mxu0 %v729_v42  ;;  %v732_v9 = vpack.c.bf16 %v728_v38, %v727_v17  ;;  %v752_v13 = vmul.f32 %v748_v10, %v740_v58  ;;  %v783_v14 = vsub.s32 5, %v4619_v60  ;;  %v753_v19 = vmul.f32 %v748_v10, %v741_v63 }
 0x128   : > { %3655 = vmatmul.mubr.bf16.vlgmr.msra.gmra.mxu0 %v730_v44  ;;  %1024 = vmatprep.mubr.bf16.mxu1 %v4197_v48  ;;  %v765_v15 = vpack.c.bf16 %v758_v57, %v757_v18  ;;  %v754_v23 = vmul.f32 %v748_v10, %v742_v2  ;;  %v759_v33 = vadd.f32 %v4648_v25, %v751_v12 }
 0x129   : > { %3658 = vmatprep.mubr.bf16.mxu0 %v731_v55  ;;  %v760_v6 = vadd.f32 %v4648_v25, %v752_v13  ;;  %v784_v46 = vrot.slane %v4630_v5, %v783_v14  ;;  %v761_v26 = vadd.f32 %v4648_v25, %v753_v19  ;;  %v743_v7 = vsub.f32 %v4446_v47, %v4643_v21 }
 0x12a   : > { %v762_v27 = vadd.f32 %v4648_v25, %v754_v23  ;;  %v744_v28 = vsub.f32 %v4469_v59, %v4643_v21  ;;  %v773_v8 = vsub.f32 %v4419_v35, %v772_v24  ;;  %v774_v51 = vsub.f32 %v4422_v36, %v772_v24 }
 0x12b   : > { %v766_v29 = vpack.c.bf16 %v760_v6, %v759_v33  ;;  %v755_v30 = vmul.f32 %v748_v10, %v743_v7  ;;  %v775_v36 = vsub.f32 %v4439_v43, %v772_v24  ;;  %v776_v21 = vsub.f32 %v4449_v49, %v772_v24 }
 0x12c   : > { %v756_v31 = vmul.f32 %v748_v10, %v744_v28  ;;  %v767_v32 = vpack.c.bf16 %v762_v27, %v761_v26  ;;  %v785_v5 = vmul.f32 %v784_v46, %v773_v8  ;;  %v786_v37 = vmul.f32 %v784_v46, %v774_v51 }
 0x12d   : > { %v763_v47 = vadd.f32 %v4648_v25, %v755_v30  ;;  %v777_v10 = vsub.f32 %v4461_v54, %v772_v24  ;;  %v778_v11 = vsub.f32 %v4482_v3, %v772_v24  ;;  %v787_v40 = vmul.f32 %v784_v46, %v775_v36 }
 0x12e   : > { %v764_v39 = vadd.f32 %v4648_v25, %v756_v31  ;;  %v793_v59 = vadd.f32 %v4648_v25, %v785_v5  ;;  %v794_v35 = vadd.f32 %v4648_v25, %v786_v37  ;;  %v788_v41 = vmul.f32 %v784_v46, %v776_v21 }
 0x12f   : > { %1025 = vmatmul.mubr.bf16.gmra.mxu1 %v730_v44  ;;  %v789_v44 = vmul.f32 %v784_v46, %v777_v10  ;;  %v790_v45 = vmul.f32 %v784_v46, %v778_v11  ;;  %v795_v50 = vadd.f32 %v4648_v25, %v787_v40  ;;  %v779_v3 = vsub.f32 %v4496_v20, %v772_v24  ;;  %v837_v20 = vld [vmem:[%s5798_s6] sm:$0x7] }
 0x130   : > { %3659 = vmatmul.mubr.bf16.gmra.mxu0 %v732_v9  ;;  %1034 = vmatprep.mubr.bf16.mxu1 %v4197_v48  ;;  %v768_v16 = vpack.c.bf16 %v764_v39, %v763_v47  ;;  %v801_v42 = vpack.c.bf16 %v794_v35, %v793_v59  ;;  %v796_v43 = vadd.f32 %v4648_v25, %v788_v41 }
 0x131   : > { %3662 = vmatprep.mubr.bf16.mxu0 %v765_v15  ;;  %v797_v49 = vadd.f32 %v4648_v25, %v789_v44  ;;  %v798_v54 = vadd.f32 %v4648_v25, %v790_v45  ;;  %v780_v52 = vsub.f32 %v4510_v34, %v772_v24  ;;  %v4767_v36 = vrot.slane %v837_v20, %v705_v0 }
 0x132   : > { %v802_v53 = vpack.c.bf16 %v796_v43, %v795_v50 }
 0x133   : > { %v792_v56 = vmul.f32 %v784_v46, %v780_v52  ;;  %v803_v1 = vpack.c.bf16 %v798_v54, %v797_v49 }
 0x135   : > { %v800_v38 = vadd.f32 %v4648_v25, %v792_v56 }
 0x137   : > { %1035 = vmatmul.mubr.bf16.gmra.mxu1 %v731_v55  ;;  %v791_v55 = vmul.f32 %v784_v46, %v779_v3 }
 0x138   : > { %3663 = vmatmul.mubr.bf16.gmra.mxu0 %v766_v29  ;;  %1044 = vmatprep.mubr.bf16.mxu1 %v4197_v48 }
 0x139   : > { %3666 = vmatprep.mubr.bf16.mxu0 %v767_v32  ;;  %v799_v17 = vadd.f32 %v4648_v25, %v791_v55  ;;  %v4723_v25 = vrot.slane %v837_v20, %v686_v61 }
 0x13b   : > { %v804_v18 = vpack.c.bf16 %v800_v38, %v799_v17 }
 0x13f   : > { %1045 = vmatmul.mubr.bf16.gmra.mxu1 %v732_v9 }
 0x140   : > { %3667 = vmatmul.mubr.bf16.gmra.mxu0 %v768_v16  ;;  %1054 = vmatprep.mubr.bf16.mxu1 %v4197_v48 }
 0x141   : > { %3670 = vmatprep.mubr.bf16.mxu0 %v801_v42 }
 0x147   : > { %1055 = vmatmul.mubr.bf16.gmra.mxu1 %v765_v15 }
 0x148   : > { %3671 = vmatmul.mubr.bf16.gmra.mxu0 %v802_v53  ;;  %1064 = vmatprep.mubr.bf16.mxu1 %v4197_v48 }
 0x149   : > { %3674 = vmatprep.mubr.bf16.mxu0 %v803_v1 }
 0x14f   : > { %1065 = vmatmul.mubr.bf16.gmra.mxu1 %v766_v29  ;;  %v4747_v29 = vrot.slane %v837_v20, %v735_v4 }
 0x150   : > { %3675 = vmatmul.mubr.bf16.gmra.mxu0 %v804_v18  ;;  %1074 = vmatprep.mubr.bf16.mxu1 %v4197_v48 }
 0x157   : > { %1075 = vmatmul.mubr.bf16.gmra.mxu1 %v767_v32 }
 0x158   : > { %1084 = vmatprep.mubr.bf16.mxu1 %v4197_v48 }
 0x15f   : > { %1085 = vmatmul.mubr.bf16.gmra.mxu1 %v768_v16 }
 0x160   : > { %1094 = vmatprep.mubr.bf16.mxu1 %v4197_v48 }
 0x167   : > { %1095 = vmatmul.mubr.bf16.gmra.mxu1 %v801_v42 }
 0x168   : > { %1104 = vmatprep.mubr.bf16.mxu1 %v4197_v48 }
 0x16f   : > { %1105 = vmatmul.mubr.bf16.gmra.mxu1 %v802_v53 }
 0x170   : > { %1114 = vmatprep.mubr.bf16.mxu1 %v4197_v48 }
 0x177   : > { %1115 = vmatmul.mubr.bf16.gmra.mxu1 %v803_v1 }
 0x178   : > { %1124 = vmatprep.mubr.bf16.mxu1 %v4197_v48 }
 0x17f   : > { %1125 = vmatmul.mubr.bf16.gmra.mxu1 %v804_v18 }
 0x1e7   : > { %v1016_v34 = vpop.f32.mrf.mxu1 }
 0x1e8   : > { %v3656_v57 = vpop.f32.mrf.mxu0  ;;  %v1017_v63 = vadd.f32 %v1016_v34, %v4723_v25 }
 0x1e9   : > { %v4725_v22 = vpop.f32.mrf.mxu1 }
 0x1ea   : > { %v1169_v58 = vpop.f32.mrf.mxu0 }
 0x1eb   : > { %v1020_v62 = vpop.f32.mrf.mxu1 }
 0x1ec   : > { %v1021_v2 = vadd.f32 %v1020_v62, %v4723_v25  ;;  %v3657_v9 = vpop.f32.mrf.mxu0 }
 0x1ed   : > { %v4729_v12 = vpop.f32.mrf.mxu1 }
 0x1ee   : > { %v4731_v13 = vpack.c.bf16 %v1021_v2, %v1017_v63  ;;  %v1172_v14 = vpop.f32.mrf.mxu0 }
 0x1ef   : > { %v4733_v15 = vpop.f32.mrf.mxu1  ;;  %v1023_v14 = vadd.f32 %v4729_v12, %v4767_v36 }
 0x1f0   : > { %v3660_v19 = vpop.f32.mrf.mxu0 }
 0x1f1   : > { %v1028_v61 = vpop.f32.mrf.mxu1 }
 0x1f2   : > { %v1185_v23 = vpop.f32.mrf.mxu0  ;;  %v1029_v38 = vadd.f32 %v1028_v61, %v4767_v36 }
 0x1f3   : > { %v4735_v24 = vpop.f32.mrf.mxu1 }
 0x1f4   : > { %v3661_v33 = vpop.f32.mrf.mxu0 }
 0x1f5   : > { %v1032_v6 = vpop.f32.mrf.mxu1  ;;  %v1019_v33 = vadd.f32 %v4725_v22, %v4767_v36 }
 0x1f6   : > { %v1188_v46 = vpop.f32.mrf.mxu0  ;;  %v1033_v55 = vadd.f32 %v1032_v6, %v4767_v36 }
 0x1f7   : > { %v4737_v26 = vpop.f32.mrf.mxu1  ;;  %v1376_v46 = vpack.c.bf16 %v1023_v14, %v1019_v33 }
 0x1f8   : > { %v4739_v27 = vpop.f32.mrf.mxu0  ;;  %v1377_v34 = vpack.c.bf16 %v1033_v55, %v1029_v38 }
 0x1f9   : > { %v1038_v7 = vpop.f32.mrf.mxu1 }
 0x1fa   : > { %v1201_v28 = vpop.f32.mrf.mxu0  ;;  %v1039_v44 = vadd.f32 %v1038_v7, %v4767_v36 }
 0x1fb   : > { %v4741_v8 = vpop.f32.mrf.mxu1  ;;  %v4750_v32 = vadd.f32 %v1201_v28, %v4747_v29 }
 0x1fc   : > { %v4743_v51 = vpop.f32.mrf.mxu0 }
 0x1fd   : > { %v1042_v30 = vpop.f32.mrf.mxu1 }
 0x1fe   : > { %v1204_v31 = vpop.f32.mrf.mxu0  ;;  %v1043_v11 = vadd.f32 %v1042_v30, %v4767_v36 }
 0x1ff   : > { %v4753_v5 = vadd.f32 %v1204_v31, %v4747_v29  ;;  %v1046_v37 = vpop.f32.mrf.mxu1 }
 0x200   : > { %v4755_v47 = vpop.f32.mrf.mxu0  ;;  %v1378_v60 = vpack.c.bf16 %v1043_v11, %v1039_v44  ;;  %v1047_v11 = vadd.f32 %v1046_v37, %v4723_v25  ;;  %v1041_v37 = vadd.f32 %v4741_v8, %v4723_v25 }
 0x201   : > { %v4759_v39 = vpack.c.bf16 %v4753_v5, %v4750_v32  ;;  %v1048_v59 = vpop.f32.mrf.mxu1 }
 0x202   : > { %v4761_v35 = vpop.f32.mrf.mxu0  ;;  %v1049_v16 = vadd.f32 %v1048_v59, %v4767_v36 }
 0x203   : > { %v1050_v4 = vpop.f32.mrf.mxu1  ;;  %3686 = vmatprep.mubr.bf16.mxu0 %v4759_v39  ;;  %3718 = vmatprep.mubr.bf16.mxu1 %v4759_v39 }
 0x204   : > { %v4769_v21 = vpop.f32.mrf.mxu0  ;;  %v1051_v59 = vadd.f32 %v1050_v4, %v4723_v25  ;;  %v4810_v4 = vadd.f32 %v4739_v27, %v4747_v29 }
 0x205   : > { %v1052_v10 = vpop.f32.mrf.mxu1  ;;  %v4842_v38 = vadd.f32 %v4769_v21, %v4747_v29 }
 0x206   : > { %v1053_v40 = vadd.f32 %v1052_v10, %v4767_v36  ;;  %v1220_v41 = vpop.f32.mrf.mxu0 }
 0x207   : > { %v1056_v42 = vpop.f32.mrf.mxu1  ;;  %v4806_v44 = vadd.f32 %v1220_v41, %v4747_v29 }
 0x208   : > { %v1379_v45 = vpack.c.bf16 %v1053_v40, %v1049_v16  ;;  %v3672_v50 = vpop.f32.mrf.mxu0  ;;  %v1057_v54 = vadd.f32 %v1056_v42, %v4723_v25  ;;  %v1367_v40 = vpack.c.bf16 %v1051_v59, %v1047_v11  ;;  %v4803_v42 = vadd.f32 %v4743_v51, %v4747_v29 }
 0x209   : > { %v4775_v43 = vpop.f32.mrf.mxu1  ;;  %v4818_v51 = vadd.f32 %v4761_v35, %v4747_v29  ;;  %v1031_v35 = vadd.f32 %v4735_v24, %v4723_v25 }
 0x20a   : > { %v1233_v0 = vpop.f32.mrf.mxu0  ;;  %3678 = vmatprep.subr.bf16.mxu0 %v1379_v45  ;;  %v4825_v27 = vpack.c.bf16 %v4803_v42, %v4810_v4 }
 0x20b   : > { %v1060_v49 = vpop.f32.mrf.mxu1  ;;  %3679 = vmatpush3.bf16.xpose.msra.mxu0 %v1379_v45  ;;  %v4829_v8 = vpack.c.bf16 %v4806_v44, %v4818_v51 }
 0x20c   : > { %v1061_v3 = vadd.f32 %v1060_v49, %v4723_v25  ;;  %v3673_v52 = vpop.f32.mrf.mxu0  ;;  %3680 = vmatprep.subr.bf16.mxu0 %v1378_v60  ;;  %v1037_v49 = vadd.f32 %v4737_v26, %v4723_v25  ;;  %v1027_v26 = vadd.f32 %v4733_v15, %v4723_v25  ;;  %v4850_v15 = vadd.f32 %v4755_v47, %v4747_v29 }
 0x20d   : > { %v4779_v53 = vpop.f32.mrf.mxu1 }
 0x20e   : > { %v4782_v56 = vpack.c.bf16 %v1061_v3, %v1057_v54  ;;  %v1236_v1 = vpop.f32.mrf.mxu0  ;;  %v1366_v55 = vpack.c.bf16 %v1041_v37, %v1037_v49 }
 0x20f   : > { %v1066_v17 = vpop.f32.mrf.mxu1 }
 0x210   : > { %v3676_v18 = vpop.f32.mrf.mxu0  ;;  %v1067_v62 = vadd.f32 %v1066_v17, %v4723_v25 }
 0x211   : > { %v4785_v20 = vpop.f32.mrf.mxu1 }
 0x212   : > { %v1249_v57 = vpop.f32.mrf.mxu0 }
 0x213   : > { %v1070_v58 = vpop.f32.mrf.mxu1  ;;  %3681 = vmatpush3.bf16.xpose.msra.mxu0 %v1378_v60  ;;  %v1365_v57 = vpack.c.bf16 %v1031_v35, %v1027_v26 }
 0x214   : > { %v1071_v63 = vadd.f32 %v1070_v58, %v4723_v25  ;;  %v3677_v2 = vpop.f32.mrf.mxu0  ;;  %3682 = vmatprep.subr.bf16.mxu0 %v1377_v34 }
 0x215   : > { %v1072_v9 = vpop.f32.mrf.mxu1  ;;  %v1069_v2 = vadd.f32 %v4785_v20, %v4767_v36 }
 0x216   : > { %v4791_v19 = vpack.c.bf16 %v1071_v63, %v1067_v62  ;;  %v1252_v61 = vpop.f32.mrf.mxu0  ;;  %v1073_v62 = vadd.f32 %v1072_v9, %v4767_v36  ;;  %v4857_v63 = vpack.c.bf16 %v4842_v38, %v4850_v15 }
 0x217   : > { %v1076_v23 = vpop.f32.mrf.mxu1 }
 0x218   : > { %v1077_v28 = vadd.f32 %v1076_v23, %v4723_v25  ;;  %v1640_v29 = vpack.c.bf16 %v1073_v62, %v1069_v2  ;;  %v4918_v62 = vld [vmem:[%s5796_s4 + $0x18] sm:$0xff] }
 0x219   : > { %v1078_v6 = vpop.f32.mrf.mxu1 }
 0x21a   : > { %v1079_v3 = vadd.f32 %v1078_v6, %v4767_v36 }
 0x21b   : > { %v1080_v7 = vpop.f32.mrf.mxu1  ;;  %3683 = vmatpush3.bf16.xpose.msra.mxu0 %v1377_v34 }
 0x21c   : > { %v1081_v30 = vadd.f32 %v1080_v7, %v4723_v25  ;;  %3684 = vmatprep.subr.bf16.mxu0 %v1376_v46  ;;  %v1063_v7 = vadd.f32 %v4779_v53, %v4767_v36 }
 0x21d   : > { %v1082_v31 = vpop.f32.mrf.mxu1 }
 0x21e   : > { %v4798_v12 = vpack.c.bf16 %v1081_v30, %v1077_v28  ;;  %v1083_v0 = vadd.f32 %v1082_v31, %v4767_v36  ;;  %v1059_v30 = vadd.f32 %v4775_v43, %v4767_v36 }
 0x21f   : > { %v1086_v10 = vpop.f32.mrf.mxu1 }
 0x220   : > { %v1641_v1 = vpack.c.bf16 %v1083_v0, %v1079_v3  ;;  %v1087_v9 = vadd.f32 %v1086_v10, %v4723_v25  ;;  %v1639_v59 = vpack.c.bf16 %v1063_v7, %v1059_v30  ;;  %v4943_v7 = vld [vmem:[%s5796_s4 + $0x20] sm:$0xff]  ;;  %v4950_v30 = vld [vmem:[%s5796_s4 + $0x30] sm:$0xff] }
 0x221   : > { %v1088_v16 = vpop.f32.mrf.mxu1 }
 0x222   : > { %v1089_v50 = vadd.f32 %v1088_v16, %v4767_v36 }
 0x223   : > { %v1090_v22 = vpop.f32.mrf.mxu1  ;;  %3685 = vmatpush3.bf16.xpose.msra.mxu0 %v1376_v46 }
 0x224   : > { %3694 = vmatprep.subr.bf16.mxu0 %v1367_v40  ;;  %v1091_v61 = vadd.f32 %v1090_v22, %v4723_v25 }
 0x225   : > { %v1092_v45 = vpop.f32.mrf.mxu1 }
 0x226   : > { %v1093_v60 = vadd.f32 %v1092_v45, %v4767_v36  ;;  %v4867_v20 = vpack.c.bf16 %v1091_v61, %v1087_v9  ;;  %v4928_v61 = vld [vmem:[%s5796_s4 + $0x8] sm:$0xff] }
 0x227   : > { %v1096_v41 = vpop.f32.mrf.mxu1 }
 0x228   : > { %v1642_v54 = vpack.c.bf16 %v1093_v60, %v1089_v50  ;;  %v1097_v18 = vadd.f32 %v1096_v41, %v4723_v25 }
 0x229   : > { %v4832_v52 = vpop.f32.mrf.mxu1 }
 0x22a   : > { %3687 = vmatmul.mubr.bf16.vlgmr.msra.gmra.mxu0 %v4825_v27  ;;  %3710 = vmatprep.subr.bf16.mxu1 %v1642_v54 }
 0x22b   : > { %v1100_v17 = vpop.f32.mrf.mxu1  ;;  %3690 = vmatprep.mubr.bf16.mxu0 %v4829_v8  ;;  %3695 = vmatpush3.bf16.msra.mxu0 %v1367_v40 }
 0x22c   : > { %v1101_v24 = vadd.f32 %v1100_v17, %v4723_v25  ;;  %3711 = vmatpush3.bf16.xpose.msra.mxu1 %v1642_v54  ;;  %3696 = vmatprep.subr.bf16.mxu0 %v1366_v55  ;;  %v1099_v17 = vadd.f32 %v4832_v52, %v4767_v36 }
 0x22d   : > { %3712 = vmatprep.subr.bf16.mxu1 %v1641_v1  ;;  %v4846_v34 = vpop.f32.mrf.mxu1 }
 0x22e   : > { %v4852_v58 = vpack.c.bf16 %v1101_v24, %v1097_v18  ;;  %v4905_v24 = vld [vmem:[%s5796_s4 + $0x10] sm:$0xff] }
 0x22f   : > { %v1106_v21 = vpop.f32.mrf.mxu1  ;;  %3697 = vmatpush3.bf16.msra.mxu0 %v1366_v55 }
 0x230   : > { %3698 = vmatprep.subr.bf16.mxu0 %v1365_v57  ;;  %v1107_v23 = vadd.f32 %v1106_v21, %v4723_v25 }
 0x231   : > { %v1108_v14 = vpop.f32.mrf.mxu1 }
 0x232   : > { %3691 = vmatmul.mubr.bf16.gmra.mxu0 %v4857_v63  ;;  %v1109_v55 = vadd.f32 %v1108_v14, %v4767_v36 }
 0x233   : > { %v1110_v47 = vpop.f32.mrf.mxu1  ;;  %3699 = vmatpush3.bf16.msra.mxu0 %v1365_v57 }
 0x234   : > { %v1111_v33 = vadd.f32 %v1110_v47, %v4723_v25  ;;  %3713 = vmatpush3.bf16.xpose.msra.mxu1 %v1641_v1  ;;  %3700 = vmatprep.subr.bf16.mxu0 %v4731_v13  ;;  %v1103_v1 = vadd.f32 %v4846_v34, %v4767_v36 }
 0x235   : > { %3714 = vmatprep.subr.bf16.mxu1 %v1640_v29  ;;  %v1112_v6 = vpop.f32.mrf.mxu1 }
 0x236   : > { %v4869_v46 = vpack.c.bf16 %v1111_v33, %v1107_v23  ;;  %v1901_v18 = vpack.c.bf16 %v1103_v1, %v1099_v17 }
 0x237   : > { %v1116_v28 = vpop.f32.mrf.mxu1  ;;  %3701 = vmatpush3.bf16.msra.mxu0 %v4731_v13 }
 0x238   : > { %3726 = vmatprep.subr.bf16.mxu0 %v4867_v20  ;;  %v1117_v11 = vadd.f32 %v1116_v28, %v4723_v25 }
 0x239   : > { %v1118_v31 = vpop.f32.mrf.mxu1 }
 0x23a   : > { %v1119_v3 = vadd.f32 %v1118_v31, %v4767_v36 }
 0x23b   : > { %v1120_v10 = vpop.f32.mrf.mxu1 }
 0x23c   : > { %v1121_v16 = vadd.f32 %v1120_v10, %v4723_v25  ;;  %3715 = vmatpush3.bf16.xpose.msra.mxu1 %v1640_v29 }
 0x23d   : > { %3716 = vmatprep.subr.bf16.mxu1 %v1639_v59  ;;  %v1122_v40 = vpop.f32.mrf.mxu1 }
 0x23e   : > { %v4879_v22 = vpack.c.bf16 %v1121_v16, %v1117_v11  ;;  %v1123_v49 = vadd.f32 %v1122_v40, %v4767_v36  ;;  %v4958_v11 = vld [vmem:[%s5796_s4 + $0x28] sm:$0xff] }
 0x23f   : > { %v1126_v53 = vpop.f32.mrf.mxu1 }
 0x240   : > { %v1127_v37 = vadd.f32 %v1126_v53, %v4723_v25  ;;  %v1903_v35 = vpack.c.bf16 %v1123_v49, %v1119_v3  ;;  %v4968_v53 = vld [vmem:[%s5796_s4 + $0x38] sm:$0xff] }
 0x241   : > { %v1128_v45 = vpop.f32.mrf.mxu1 }
 0x242   : > { %v1129_v60 = vadd.f32 %v1128_v45, %v4767_v36 }
 0x243   : > { %v1130_v13 = vpop.f32.mrf.mxu1 }
 0x244   : > { %v1131_v50 = vadd.f32 %v1130_v13, %v4723_v25  ;;  %3717 = vmatpush3.bf16.xpose.msra.mxu1 %v1639_v59  ;;  %v1113_v25 = vadd.f32 %v1112_v6, %v4767_v36 }
 0x245   : > { %v1132_v43 = vpop.f32.mrf.mxu1 }
 0x246   : > { %v4884_v0 = vpack.c.bf16 %v1131_v50, %v1127_v37  ;;  %v1133_v41 = vadd.f32 %v1132_v43, %v4767_v36  ;;  %v1902_v26 = vpack.c.bf16 %v1113_v25, %v1109_v55  ;;  %v4910_v36 = vld [vmem:[%s5796_s4] sm:$0xff] }
 0x248   : > { %v1904_v54 = vpack.c.bf16 %v1133_v41, %v1129_v60 }
 0x24a   : > { %3742 = vmatprep.subr.bf16.mxu1 %v1904_v54 }
 0x24b   : > { %3719 = vmatmul.mubr.bf16.vlgmr.msra.gmra.mxu1 %v4825_v27 }
 0x24c   : > { %3722 = vmatprep.mubr.bf16.mxu1 %v4829_v8  ;;  %3743 = vmatpush3.bf16.xpose.msra.mxu1 %v1904_v54 }
 0x24d   : > { %3744 = vmatprep.subr.bf16.mxu1 %v1903_v35 }
 0x253   : > { %3723 = vmatmul.mubr.bf16.gmra.mxu1 %v4857_v63 }
 0x254   : > { %3745 = vmatpush3.bf16.xpose.msra.mxu1 %v1903_v35  ;;  %3750 = vmatprep.mubr.bf16.mxu1 %v4759_v39 }
 0x255   : > { %3746 = vmatprep.subr.bf16.mxu1 %v1902_v26 }
 0x25c   : > { %3747 = vmatpush3.bf16.xpose.msra.mxu1 %v1902_v26 }
 0x25d   : > { %3748 = vmatprep.subr.bf16.mxu1 %v1901_v18 }
 0x264   : > { %3749 = vmatpush3.bf16.xpose.msra.mxu1 %v1901_v18 }
 0x26b   : > { %3751 = vmatmul.mubr.bf16.vlgmr.msra.gmra.mxu1 %v4825_v27 }
 0x26c   : > { %3754 = vmatprep.mubr.bf16.mxu1 %v4829_v8 }
 0x273   : > { %3755 = vmatmul.mubr.bf16.gmra.mxu1 %v4857_v63 }
 0x2ea   : > { %v3688_v57 = vpop.f32.mrf.mxu0 }
 0x2eb   : > { %v4913_v52 = vadd.f32 %v3688_v57, %v4905_v24 }
 0x2ec   : > { %v1414_v34 = vpop.f32.mrf.mxu0 }
 0x2ed   : > { %v4921_v21 = vadd.f32 %v1414_v34, %v4910_v36  ;;  %v1452_v2 = vsel %vm1445_vm6, %v4913_v52, -inf }
 0x2ee   : > { %1453 = vmax.xlane.f32.xlu1 %v1452_v2  ;;  %v3689_v14 = vpop.f32.mrf.mxu0 }
 0x2ef   : > { %v4931_v29 = vadd.f32 %v3689_v14, %v4918_v62  ;;  %v1446_v47 = vsel %vm1445_vm6, %v4921_v21, -inf }
 0x2f0   : > { %v1417_v9 = vpop.f32.mrf.mxu0  ;;  %1447 = vmax.xlane.f32.xlu0 %v1446_v47 }
 0x2f1   : > { %v4936_v23 = vadd.f32 %v1417_v9, %v4928_v61  ;;  %v1455_v33 = vsel %vm1445_vm6, %v4931_v29, -inf }
 0x2f2   : > { %1456 = vmax.xlane.f32.xlu1 %v1455_v33  ;;  %v3692_v6 = vpop.f32.mrf.mxu0 }
 0x2f3   : > { %v1449_v28 = vsel %vm1445_vm6, %v4936_v23, -inf  ;;  %v4961_v16 = vadd.f32 %v3692_v6, %v4950_v30 }
 0x2f4   : > { %v1430_v31 = vpop.f32.mrf.mxu0  ;;  %1450 = vmax.xlane.f32.xlu0 %v1449_v28 }
 0x2f5   : > { %v4953_v59 = vadd.f32 %v1430_v31, %v4943_v7  ;;  %v1464_v43 = vsel %vm1445_vm6, %v4961_v16, -inf }
 0x2f6   : > { %v3693_v10 = vpop.f32.mrf.mxu0 }
 0x2f7   : > { %v1458_v40 = vsel %vm1445_vm6, %v4953_v59, -inf  ;;  %v4974_v37 = vadd.f32 %v3693_v10, %v4968_v53 }
 0x2f8   : > { %v1433_v45 = vpop.f32.mrf.mxu0  ;;  %1459 = vmax.xlane.f32.xlu0 %v1458_v40 }
 0x2f9   : > { %v4971_v13 = vadd.f32 %v1433_v45, %v4958_v11  ;;  %v1467_v60 = vsel %vm1445_vm6, %v4974_v37, -inf }
 0x2fb   : > { %v1461_v50 = vsel %vm1445_vm6, %v4971_v13, -inf }
 0x2fc   : > { %1462 = vmax.xlane.f32.xlu1 %v1461_v50  ;;  %1465 = vmax.xlane.f32.xlu0 %v1464_v43 }
 0x300   : > { %1468 = vmax.xlane.f32.xlu1 %v1467_v60 }
 0x30b   : > { %v3720_v41 = vpop.f32.mrf.mxu1 }
 0x30c   : > { %v4986_v35 = vadd.f32 %v3720_v41, %v4905_v24 }
 0x30d   : > { %v1677_v49 = vpop.f32.mrf.mxu1 }
 0x30e   : > { %v4983_v54 = vadd.f32 %v1677_v49, %v4910_v36  ;;  %v1714_v57 = vsel %vm1445_vm6, %v4986_v35, -inf }
 0x30f   : > { %v3721_v3 = vpop.f32.mrf.mxu1 }
 0x310   : > { %v1708_v25 = vsel %vm1445_vm6, %v4983_v54, -inf  ;;  %v4994_v17 = vadd.f32 %v3721_v3, %v4918_v62 }
 0x311   : > { %v1680_v55 = vpop.f32.mrf.mxu1  ;;  %1709 = vmax.xlane.f32.xlu0 %v1708_v25 }
 0x312   : > { %v4991_v26 = vadd.f32 %v1680_v55, %v4928_v61  ;;  %v1717_v9 = vsel %vm1445_vm6, %v4994_v17, -inf }
 0x313   : > { %v3724_v1 = vpop.f32.mrf.mxu1 }
 0x314   : > { %v1711_v18 = vsel %vm1445_vm6, %v4991_v26, -inf  ;;  %v5004_v47 = vadd.f32 %v3724_v1, %v4950_v30 }
 0x315   : > { %v1693_v34 = vpop.f32.mrf.mxu1  ;;  %1712 = vmax.xlane.f32.xlu1 %v1711_v18  ;;  %1715 = vmax.xlane.f32.xlu0 %v1714_v57 }
 0x316   : > { %v5001_v2 = vadd.f32 %v1693_v34, %v4943_v7  ;;  %v1726_v40 = vsel %vm1445_vm6, %v5004_v47, -inf }
 0x317   : > { %v3725_v14 = vpop.f32.mrf.mxu1 }
 0x318   : > { %v1720_v33 = vsel %vm1445_vm6, %v5001_v2, -inf  ;;  %v5014_v31 = vadd.f32 %v3725_v14, %v4968_v53 }
 0x319   : > { %v1696_v6 = vpop.f32.mrf.mxu1  ;;  %1718 = vmax.xlane.f32.xlu1 %v1717_v9  ;;  %1721 = vmax.xlane.f32.xlu0 %v1720_v33 }
 0x31a   : > { %v5011_v28 = vadd.f32 %v1696_v6, %v4958_v11  ;;  %v1729_v45 = vsel %vm1445_vm6, %v5014_v31, -inf }
 0x31c   : > { %v1723_v10 = vsel %vm1445_vm6, %v5011_v28, -inf }
 0x31d   : > { %1724 = vmax.xlane.f32.xlu1 %v1723_v10  ;;  %1727 = vmax.xlane.f32.xlu0 %v1726_v40 }
 0x321   : > { %1730 = vmax.xlane.f32.xlu1 %v1729_v45 }
 0x32b   : > { %v3752_v50 = vpop.f32.mrf.mxu1 }
 0x32c   : > { %v5026_v49 = vadd.f32 %v3752_v50, %v4905_v24 }
 0x32d   : > { %v1939_v43 = vpop.f32.mrf.mxu1 }
 0x32e   : > { %v5023_v60 = vadd.f32 %v1939_v43, %v4910_v36  ;;  %v1976_v57 = vsel %vm1445_vm6, %v5026_v49, -inf }
 0x32f   : > { %v3753_v41 = vpop.f32.mrf.mxu1 }
 0x330   : > { %v1970_v3 = vsel %vm1445_vm6, %v5023_v60, -inf  ;;  %v5034_v18 = vadd.f32 %v3753_v41, %v4918_v62 }
 0x331   : > { %v1942_v25 = vpop.f32.mrf.mxu1  ;;  %1971 = vmax.xlane.f32.xlu0 %v1970_v3 }
 0x332   : > { %v5031_v55 = vadd.f32 %v1942_v25, %v4928_v61  ;;  %v1979_v62 = vsel %vm1445_vm6, %v5034_v18, -inf }
 0x333   : > { %v3756_v1 = vpop.f32.mrf.mxu1 }
 0x334   : > { %v1973_v36 = vsel %vm1445_vm6, %v5031_v55, -inf  ;;  %v5044_v61 = vadd.f32 %v3756_v1, %v4950_v30 }
 0x335   : > { %v1955_v24 = vpop.f32.mrf.mxu1  ;;  %1974 = vmax.xlane.f32.xlu1 %v1973_v36  ;;  %1977 = vmax.xlane.f32.xlu0 %v1976_v57 }
 0x336   : > { %v5041_v34 = vadd.f32 %v1955_v24, %v4943_v7  ;;  %v1988_v30 = vsel %vm1445_vm6, %v5044_v61, -inf }
 0x337   : > { %v3757_v14 = vpop.f32.mrf.mxu1 }
 0x338   : > { %v1982_v9 = vsel %vm1445_vm6, %v5041_v34, -inf  ;;  %v5054_v10 = vadd.f32 %v3757_v14, %v4968_v53 }
 0x339   : > { %v1958_v33 = vpop.f32.mrf.mxu1  ;;  %1980 = vmax.xlane.f32.xlu1 %v1979_v62  ;;  %1983 = vmax.xlane.f32.xlu0 %v1982_v9 }
 0x33a   : > { %v5051_v6 = vadd.f32 %v1958_v33, %v4958_v11  ;;  %v1991_v40 = vsel %vm1445_vm6, %v5054_v10, -inf }
 0x33c   : > { %v1985_v7 = vsel %vm1445_vm6, %v5051_v6, -inf }
 0x33d   : > { %1986 = vmax.xlane.f32.xlu1 %v1985_v7  ;;  %1989 = vmax.xlane.f32.xlu0 %v1988_v30 }
 0x341   : > { %1992 = vmax.xlane.f32.xlu1 %v1991_v40 }
 0x377   : > { %v1454_v45 = vpop.xlane.xlu1 %1453 }
 0x378   : > { %v1472_v50 = vsub.f32 %v4913_v52, %v1454_v45 }
 0x379   : > { %v1448_v11 = vpop.xlane.xlu0 %1447 }
 0x37a   : > { %v1470_v43 = vsub.f32 %v4921_v21, %v1448_v11  ;;  %v1482_v41 = vmul.f32 1.442695, %v1472_v50 }
 0x37b   : > { %v1457_v53 = vpop.xlane.xlu1 %1456 }
 0x37c   : > { %v1478_v3 = vmul.f32 1.442695, %v1470_v43  ;;  %v1473_v25 = vsub.f32 %v4931_v29, %v1457_v53 }
 0x37d   : > { %v1451_v1 = vpop.xlane.xlu0 %1450 }
 0x37e   : > { %3989 = vpow2.f32 %v1478_v3  ;;  %v1471_v36 = vsub.f32 %v4936_v23, %v1451_v1  ;;  %v1484_v57 = vmul.f32 1.442695, %v1473_v25 }
 0x37f   : > { %3991 = vpow2.f32 %v1482_v41 }
 0x380   : > { %v1480_v24 = vmul.f32 1.442695, %v1471_v36 }
 0x381   : > { %v1460_v14 = vpop.xlane.xlu0 %1459 }
 0x382   : > { %3993 = vpow2.f32 %v1480_v24  ;;  %v1474_v62 = vsub.f32 %v4953_v59, %v1460_v14 }
 0x383   : > { %3995 = vpow2.f32 %v1484_v57 }
 0x384   : > { %v1486_v52 = vmul.f32 1.442695, %v1474_v62 }
 0x385   : > { %v1463_v9 = vpop.xlane.xlu1 %1462  ;;  %v1466_v21 = vpop.xlane.xlu0 %1465 }
 0x386   : > { %3997 = vpow2.f32 %v1486_v52  ;;  %v1475_v33 = vsub.f32 %v4971_v13, %v1463_v9  ;;  %v1476_v29 = vsub.f32 %v4961_v16, %v1466_v21 }
 0x388   : > { %v1488_v7 = vmul.f32 1.442695, %v1475_v33  ;;  %v1490_v30 = vmul.f32 1.442695, %v1476_v29 }
 0x389   : > { %v1469_v40 = vpop.xlane.xlu1 %1468 }
 0x38a   : > { %3999 = vpow2.f32 %v1488_v7  ;;  %v1477_v23 = vsub.f32 %v4974_v37, %v1469_v40 }
 0x38b   : > { %v5070_v45 = vpop.eup %3989  ;;  %4001 = vpow2.f32 %v1490_v30 }
 0x38c   : > { %v1492_v50 = vmul.f32 1.442695, %v1477_v23  ;;  %v1494_v59 = vsel %vm1445_vm6, %v5070_v45, 0.0  ;;  %v5074_v11 = vpop.eup %3991 }
 0x38d   : > { %1495 = vadd.xlane.f32.xlu0 %v1494_v59  ;;  %v1500_v16 = vsel %vm1445_vm6, %v5074_v11, 0.0 }
 0x38e   : > { %4003 = vpow2.f32 %v1492_v50 }
 0x38f   : > { %v5076_v13 = vpop.eup %3993 }
 0x390   : > { %v1497_v43 = vsel %vm1445_vm6, %v5076_v13, 0.0  ;;  %v5082_v37 = vpop.eup %3995 }
 0x391   : > { %1501 = vadd.xlane.f32.xlu0 %v1500_v16  ;;  %1498 = vadd.xlane.f32.xlu1 %v1497_v43  ;;  %v1503_v41 = vsel %vm1445_vm6, %v5082_v37, 0.0 }
 0x393   : > { %v5084_v53 = vpop.eup %3997 }
 0x394   : > { %v1506_v3 = vsel %vm1445_vm6, %v5084_v53, 0.0 }
 0x395   : > { %1504 = vadd.xlane.f32.xlu1 %v1503_v41  ;;  %1507 = vadd.xlane.f32.xlu0 %v1506_v3 }
 0x397   : > { %v5090_v25 = vpop.eup %3999 }
 0x398   : > { %v5092_v1 = vpop.eup %4001  ;;  %v1509_v36 = vsel %vm1445_vm6, %v5090_v25, 0.0 }
 0x399   : > { %1510 = vadd.xlane.f32.xlu1 %v1509_v36  ;;  %v1512_v57 = vsel %vm1445_vm6, %v5092_v1, 0.0 }
 0x39a   : > { %1513 = vadd.xlane.f32.xlu0 %v1512_v57  ;;  %v1710_v24 = vpop.xlane.xlu0 %1709 }
 0x39b   : > { %v5098_v14 = vpop.eup %4003  ;;  %v1732_v62 = vsub.f32 %v4983_v54, %v1710_v24 }
 0x39c   : > { %v1515_v52 = vsel %vm1445_vm6, %v5098_v14, 0.0 }
 0x39d   : > { %v1740_v9 = vmul.f32 1.442695, %v1732_v62  ;;  %1516 = vadd.xlane.f32.xlu1 %v1515_v52 }
 0x39e   : > { %v1713_v21 = vpop.xlane.xlu1 %1712  ;;  %v1716_v33 = vpop.xlane.xlu0 %1715 }
 0x39f   : > { %4005 = vpow2.f32 %v1740_v9  ;;  %v1733_v29 = vsub.f32 %v4991_v26, %v1713_v21  ;;  %v1734_v7 = vsub.f32 %v4986_v35, %v1716_v33 }
 0x3a1   : > { %v1742_v30 = vmul.f32 1.442695, %v1733_v29  ;;  %v1744_v40 = vmul.f32 1.442695, %v1734_v7 }
 0x3a2   : > { %v1719_v23 = vpop.xlane.xlu1 %1718  ;;  %v1722_v50 = vpop.xlane.xlu0 %1721 }
 0x3a3   : > { %4007 = vpow2.f32 %v1742_v30  ;;  %v1735_v59 = vsub.f32 %v4994_v17, %v1719_v23  ;;  %v1736_v54 = vsub.f32 %v5001_v2, %v1722_v50 }
 0x3a4   : > { %4009 = vpow2.f32 %v1744_v40 }
 0x3a5   : > { %v1746_v16 = vmul.f32 1.442695, %v1735_v59  ;;  %v1748_v43 = vmul.f32 1.442695, %v1736_v54 }
 0x3a6   : > { %v1725_v41 = vpop.xlane.xlu1 %1724  ;;  %v1728_v3 = vpop.xlane.xlu0 %1727 }
 0x3a7   : > { %4011 = vpow2.f32 %v1746_v16  ;;  %v1737_v36 = vsub.f32 %v5011_v28, %v1725_v41  ;;  %v1738_v26 = vsub.f32 %v5004_v47, %v1728_v3 }
 0x3a8   : > { %4013 = vpow2.f32 %v1748_v43 }
 0x3a9   : > { %v1750_v35 = vmul.f32 1.442695, %v1737_v36  ;;  %v1752_v57 = vmul.f32 1.442695, %v1738_v26 }
 0x3aa   : > { %v1731_v24 = vpop.xlane.xlu1 %1730 }
 0x3ab   : > { %4015 = vpow2.f32 %v1750_v35  ;;  %v1739_v62 = vsub.f32 %v5014_v31, %v1731_v24 }
 0x3ac   : > { %v5110_v17 = vpop.eup %4005  ;;  %4017 = vpow2.f32 %v1752_v57 }
 0x3ad   : > { %v1754_v2 = vmul.f32 1.442695, %v1739_v62  ;;  %v1756_v52 = vsel %vm1445_vm6, %v5110_v17, 0.0 }
 0x3ae   : > { %1757 = vadd.xlane.f32.xlu0 %v1756_v52 }
 0x3af   : > { %4019 = vpow2.f32 %v1754_v2 }
 0x3b0   : > { %v5114_v9 = vpop.eup %4007 }
 0x3b1   : > { %v5116_v28 = vpop.eup %4009  ;;  %v1759_v47 = vsel %vm1445_vm6, %v5114_v9, 0.0 }
 0x3b2   : > { %1760 = vadd.xlane.f32.xlu1 %v1759_v47  ;;  %v1762_v31 = vsel %vm1445_vm6, %v5116_v28, 0.0 }
 0x3b3   : > { %1763 = vadd.xlane.f32.xlu0 %v1762_v31 }
 0x3b4   : > { %v5122_v21 = vpop.eup %4011 }
 0x3b5   : > { %v5124_v33 = vpop.eup %4013  ;;  %v1765_v29 = vsel %vm1445_vm6, %v5122_v21, 0.0 }
 0x3b6   : > { %1766 = vadd.xlane.f32.xlu1 %v1765_v29  ;;  %v1768_v7 = vsel %vm1445_vm6, %v5124_v33, 0.0 }
 0x3b7   : > { %1769 = vadd.xlane.f32.xlu0 %v1768_v7 }
 0x3b8   : > { %v5130_v30 = vpop.eup %4015 }
 0x3b9   : > { %v5132_v40 = vpop.eup %4017  ;;  %v1771_v23 = vsel %vm1445_vm6, %v5130_v30, 0.0 }
 0x3ba   : > { %1772 = vadd.xlane.f32.xlu1 %v1771_v23  ;;  %v1774_v50 = vsel %vm1445_vm6, %v5132_v40, 0.0  ;;  %v1972_v59 = vpop.xlane.xlu0 %1971 }
 0x3bb   : > { %1775 = vadd.xlane.f32.xlu0 %v1774_v50  ;;  %v1994_v54 = vsub.f32 %v5023_v60, %v1972_v59 }
 0x3bc   : > { %v5139_v16 = vpop.eup %4019 }
 0x3bd   : > { %v2002_v43 = vmul.f32 1.442695, %v1994_v54  ;;  %v1777_v41 = vsel %vm1445_vm6, %v5139_v16, 0.0 }
 0x3be   : > { %v1975_v3 = vpop.xlane.xlu1 %1974  ;;  %1778 = vadd.xlane.f32.xlu1 %v1777_v41  ;;  %v1978_v36 = vpop.xlane.xlu0 %1977 }
 0x3bf   : > { %4021 = vpow2.f32 %v2002_v43  ;;  %v1995_v26 = vsub.f32 %v5031_v55, %v1975_v3  ;;  %v1996_v35 = vsub.f32 %v5026_v49, %v1978_v36 }
 0x3c1   : > { %v2004_v57 = vmul.f32 1.442695, %v1995_v26  ;;  %v2006_v24 = vmul.f32 1.442695, %v1996_v35 }
 0x3c2   : > { %v1981_v62 = vpop.xlane.xlu1 %1980  ;;  %v1984_v2 = vpop.xlane.xlu0 %1983 }
 0x3c3   : > { %4023 = vpow2.f32 %v2004_v57  ;;  %v1997_v60 = vsub.f32 %v5034_v18, %v1981_v62  ;;  %v1998_v52 = vsub.f32 %v5041_v34, %v1984_v2 }
 0x3c4   : > { %4025 = vpow2.f32 %v2006_v24 }
 0x3c5   : > { %v2008_v47 = vmul.f32 1.442695, %v1997_v60  ;;  %v2010_v31 = vmul.f32 1.442695, %v1998_v52 }
 0x3c6   : > { %v1987_v29 = vpop.xlane.xlu1 %1986  ;;  %v1990_v7 = vpop.xlane.xlu0 %1989 }
 0x3c7   : > { %4027 = vpow2.f32 %v2008_v47  ;;  %v1999_v23 = vsub.f32 %v5051_v6, %v1987_v29  ;;  %v2000_v55 = vsub.f32 %v5044_v61, %v1990_v7 }
 0x3c8   : > { %4029 = vpow2.f32 %v2010_v31 }
 0x3c9   : > { %v2012_v49 = vmul.f32 1.442695, %v1999_v23  ;;  %v2014_v50 = vmul.f32 1.442695, %v2000_v55 }
 0x3ca   : > { %v1993_v59 = vpop.xlane.xlu1 %1992 }
 0x3cb   : > { %4031 = vpow2.f32 %v2012_v49  ;;  %v2001_v54 = vsub.f32 %v5054_v10, %v1993_v59 }
 0x3cc   : > { %v5150_v18 = vpop.eup %4021  ;;  %4033 = vpow2.f32 %v2014_v50 }
 0x3cd   : > { %v2016_v34 = vmul.f32 1.442695, %v2001_v54  ;;  %v2018_v43 = vsel %vm1445_vm6, %v5150_v18, 0.0 }
 0x3ce   : > { %2019 = vadd.xlane.f32.xlu0 %v2018_v43 }
 0x3cf   : > { %4035 = vpow2.f32 %v2016_v34 }
 0x3d0   : > { %v5154_v41 = vpop.eup %4023 }
 0x3d1   : > { %v5156_v6 = vpop.eup %4025  ;;  %v2021_v61 = vsel %vm1445_vm6, %v5154_v41, 0.0 }
 0x3d2   : > { %2022 = vadd.xlane.f32.xlu1 %v2021_v61  ;;  %v2024_v10 = vsel %vm1445_vm6, %v5156_v6, 0.0 }
 0x3d3   : > { %2025 = vadd.xlane.f32.xlu0 %v2024_v10 }
 0x3d4   : > { %v5162_v3 = vpop.eup %4027 }
 0x3d5   : > { %v5164_v36 = vpop.eup %4029  ;;  %v2027_v26 = vsel %vm1445_vm6, %v5162_v3, 0.0 }
 0x3d6   : > { %2028 = vadd.xlane.f32.xlu1 %v2027_v26  ;;  %v2030_v35 = vsel %vm1445_vm6, %v5164_v36, 0.0 }
 0x3d7   : > { %2031 = vadd.xlane.f32.xlu0 %v2030_v35 }
 0x3d8   : > { %v5170_v57 = vpop.eup %4031 }
 0x3d9   : > { %v5172_v24 = vpop.eup %4033  ;;  %v2033_v62 = vsel %vm1445_vm6, %v5170_v57, 0.0 }
 0x3da   : > { %2034 = vadd.xlane.f32.xlu1 %v2033_v62  ;;  %v2036_v2 = vsel %vm1445_vm6, %v5172_v24, 0.0 }
 0x3db   : > { %2037 = vadd.xlane.f32.xlu0 %v2036_v2 }
 0x3dc   : > { %v5178_v60 = vpop.eup %4035 }
 0x3dd   : > { %v2039_v52 = vsel %vm1445_vm6, %v5178_v60, 0.0 }
 0x3de   : > { %2040 = vadd.xlane.f32.xlu1 %v2039_v52 }
 0x416   : > { %v1496_v47 = vpop.xlane.xlu0 %1495 }
 0x417   : > { %4037 = vrcp.f32 %v1496_v47 }
 0x41a   : > { %v1499_v31 = vpop.xlane.xlu1 %1498  ;;  %v1502_v29 = vpop.xlane.xlu0 %1501 }
 0x41b   : > { %4039 = vrcp.f32 %v1499_v31 }
 0x41c   : > { %4041 = vrcp.f32 %v1502_v29 }
 0x41e   : > { %v1505_v7 = vpop.xlane.xlu1 %1504  ;;  %v1508_v23 = vpop.xlane.xlu0 %1507 }
 0x41f   : > { %4043 = vrcp.f32 %v1505_v7 }
 0x420   : > { %4045 = vrcp.f32 %v1508_v23 }
 0x422   : > { %v1511_v55 = vpop.xlane.xlu1 %1510 }
 0x423   : > { %4047 = vrcp.f32 %v1511_v55  ;;  %v1514_v49 = vpop.xlane.xlu0 %1513 }
 0x424   : > { %4049 = vrcp.f32 %v1514_v49  ;;  %v4038_v50 = vpop.eup %4037 }
 0x425   : > { %v1526_v34 = vmul.f32 %v4038_v50, %v5070_v45 }
 0x426   : > { %v1517_v59 = vpop.xlane.xlu1 %1516 }
 0x427   : > { %4051 = vrcp.f32 %v1517_v59 }
 0x428   : > { %v4040_v54 = vpop.eup %4039 }
 0x429   : > { %v1527_v43 = vmul.f32 %v4040_v54, %v5076_v13  ;;  %v4042_v61 = vpop.eup %4041 }
 0x42a   : > { %v1528_v35 = vmul.f32 %v4042_v61, %v5074_v11 }
 0x42b   : > { %v1534_v10 = vpack.c.bf16 %v1527_v43, %v1526_v34 }
 0x42c   : > { %v4044_v26 = vpop.eup %4043 }
 0x42d   : > { %v1529_v62 = vmul.f32 %v4044_v26, %v5082_v37  ;;  %3702 = vmatprep.mubr.msk.bf16.mxu0 %vm1445_vm6, %v1534_v10  ;;  %v4046_v2 = vpop.eup %4045 }
 0x42e   : > { %v1530_v31 = vmul.f32 %v4046_v2, %v5084_v53 }
 0x42f   : > { %v1535_v52 = vpack.c.bf16 %v1529_v62, %v1528_v35 }
 0x430   : > { %v4048_v47 = vpop.eup %4047 }
 0x431   : > { %3703 = vmatmul.mubr.msk.bf16.vlgmr.msra.gmra.mxu0 %vm1445_vm6, %v1535_v52  ;;  %v1531_v45 = vmul.f32 %v4048_v47, %v5090_v25  ;;  %v4050_v29 = vpop.eup %4049 }
 0x432   : > { %3727 = vmatpush3.bf16.msra.mxu0 %v4867_v20  ;;  %v1532_v37 = vmul.f32 %v4050_v29, %v5092_v1 }
 0x433   : > { %3728 = vmatprep.subr.bf16.mxu0 %v4798_v12  ;;  %v1536_v13 = vpack.c.bf16 %v1531_v45, %v1530_v31 }
 0x434   : > { %v4052_v11 = vpop.eup %4051 }
 0x435   : > { %3706 = vmatprep.mubr.msk.bf16.mxu0 %vm1445_vm6, %v1536_v13  ;;  %v1533_v7 = vmul.f32 %v4052_v11, %v5098_v14 }
 0x436   : > { %3729 = vmatpush3.bf16.msra.mxu0 %v4798_v12 }
 0x437   : > { %3730 = vmatprep.subr.bf16.mxu0 %v4791_v19  ;;  %v1758_v53 = vpop.xlane.xlu0 %1757  ;;  %v1537_v23 = vpack.c.bf16 %v1533_v7, %v1532_v37 }
 0x438   : > { %4053 = vrcp.f32 %v1758_v53 }
 0x439   : > { %3707 = vmatmul.mubr.msk.bf16.gmra.mxu0 %vm1445_vm6, %v1537_v23 }
 0x43a   : > { %3731 = vmatpush3.bf16.msra.mxu0 %v4791_v19 }
 0x43b   : > { %v1761_v20 = vpop.xlane.xlu1 %1760  ;;  %3732 = vmatprep.subr.bf16.mxu0 %v4782_v56 }
 0x43c   : > { %4055 = vrcp.f32 %v1761_v20  ;;  %v1764_v25 = vpop.xlane.xlu0 %1763 }
 0x43d   : > { %4057 = vrcp.f32 %v1764_v25 }
 0x43e   : > { %3733 = vmatpush3.bf16.msra.mxu0 %v4782_v56 }
 0x43f   : > { %v1767_v1 = vpop.xlane.xlu1 %1766  ;;  %3758 = vmatprep.subr.bf16.mxu0 %v4884_v0 }
 0x440   : > { %4059 = vrcp.f32 %v1767_v1  ;;  %v1770_v12 = vpop.xlane.xlu0 %1769 }
 0x441   : > { %4061 = vrcp.f32 %v1770_v12  ;;  %v3915_v12 = vld [vmem:[%s5802_s10 + $0x70] ss:$8 sps:$4 sm:$0xff]  }
 0x443   : > { %v1773_v14 = vpop.xlane.xlu1 %1772 }
 0x444   : > { %4063 = vrcp.f32 %v1773_v14  ;;  %v1776_v55 = vpop.xlane.xlu0 %1775 }
 0x445   : > { %4065 = vrcp.f32 %v1776_v55  ;;  %v4054_v49 = vpop.eup %4053 }
 0x446   : > { %v1788_v59 = vmul.f32 %v4054_v49, %v5110_v17  ;;  %v3918_v49 = vld [vmem:[%s5802_s10 + $0x60] ss:$8 sps:$4 sm:$0xff]  }
 0x447   : > { %v1779_v19 = vpop.xlane.xlu1 %1778 }
 0x448   : > { %4067 = vrcp.f32 %v1779_v19 }
 0x449   : > { %v4056_v50 = vpop.eup %4055 }
 0x44a   : > { %v1789_v54 = vmul.f32 %v4056_v50, %v5114_v9  ;;  %v4058_v34 = vpop.eup %4057  ;;  %v3923_v50 = vld [vmem:[%s5802_s10 + $0x54] ss:$8 sps:$4 sm:$0xff]  }
 0x44b   : > { %v1790_v61 = vmul.f32 %v4058_v34, %v5116_v28 }
 0x44c   : > { %v1796_v56 = vpack.c.bf16 %v1789_v54, %v1788_v59 }
 0x44d   : > { %v4060_v43 = vpop.eup %4059 }
 0x44e   : > { %v1791_v10 = vmul.f32 %v4060_v43, %v5122_v21  ;;  %3734 = vmatprep.mubr.msk.bf16.mxu0 %vm1445_vm6, %v1796_v56  ;;  %v4062_v26 = vpop.eup %4061  ;;  %v3926_v56 = vld [vmem:[%s5802_s10 + $0x44] ss:$8 sps:$4 sm:$0xff]   ;;  %v3927_v43 = vld [vmem:[%s5802_s10 + $0x30] ss:$8 sps:$4 sm:$0xff]  }
 0x44f   : > { %v1792_v2 = vmul.f32 %v4062_v26, %v5124_v33  ;;  %v3935_v26 = vld [vmem:[%s5802_s10 + $0x14] ss:$8 sps:$4 sm:$0xff]  }
 0x450   : > { %v1797_v35 = vpack.c.bf16 %v1791_v10, %v1790_v61  ;;  %v3932_v61 = vld [vmem:[%s5802_s10 + $0x24] ss:$8 sps:$4 sm:$0xff]   ;;  %v3930_v10 = vld [vmem:[%s5802_s10 + $0x20] ss:$8 sps:$4 sm:$0xff]  }
 0x451   : > { %v4064_v62 = vpop.eup %4063 }
 0x452   : > { %3735 = vmatmul.mubr.msk.bf16.vlgmr.msra.gmra.mxu0 %vm1445_vm6, %v1797_v35  ;;  %v1793_v17 = vmul.f32 %v4064_v62, %v5130_v30  ;;  %v4066_v52 = vpop.eup %4065  ;;  %v3933_v35 = vld [vmem:[%s5802_s10 + $0x10] ss:$8 sps:$4 sm:$0xff]   ;;  %v3938_v62 = vld [vmem:[%s5802_s10 + $0x4] ss:$8 sps:$4 sm:$0xff]  }
 0x453   : > { %3759 = vmatpush3.bf16.msra.mxu0 %v4884_v0  ;;  %v1794_v21 = vmul.f32 %v4066_v52, %v5132_v40  ;;  %v3917_v40 = vld [vmem:[%s5802_s10 + $0x74] ss:$8 sps:$4 sm:$0xff]  }
 0x454   : > { %3760 = vmatprep.subr.bf16.mxu0 %v4879_v22  ;;  %v1798_v9 = vpack.c.bf16 %v1793_v17, %v1792_v2  ;;  %v3936_v2 = vld [vmem:[%s5802_s10] ss:$8 sps:$4 sm:$0xff]  }
 0x455   : > { %v4068_v28 = vpop.eup %4067 }
 0x456   : > { %3738 = vmatprep.mubr.msk.bf16.mxu0 %vm1445_vm6, %v1798_v9  ;;  %v1795_v47 = vmul.f32 %v4068_v28, %v5139_v16 }
 0x457   : > { %3761 = vmatpush3.bf16.msra.mxu0 %v4879_v22  ;;  %v2020_v31 = vpop.xlane.xlu0 %2019 }
 0x458   : > { %3762 = vmatprep.subr.bf16.mxu0 %v4869_v46  ;;  %v1799_v33 = vpack.c.bf16 %v1795_v47, %v1794_v21  ;;  %4069 = vrcp.f32 %v2020_v31 }
 0x45a   : > { %3739 = vmatmul.mubr.msk.bf16.gmra.mxu0 %vm1445_vm6, %v1799_v33 }
 0x45b   : > { %3763 = vmatpush3.bf16.msra.mxu0 %v4869_v46  ;;  %v2023_v0 = vpop.xlane.xlu1 %2022 }
 0x45c   : > { %4071 = vrcp.f32 %v2023_v0  ;;  %3764 = vmatprep.subr.bf16.mxu0 %v4852_v58  ;;  %v2026_v30 = vpop.xlane.xlu0 %2025 }
 0x45d   : > { %4073 = vrcp.f32 %v2026_v30 }
 0x45f   : > { %3765 = vmatpush3.bf16.msra.mxu0 %v4852_v58  ;;  %v2029_v22 = vpop.xlane.xlu1 %2028 }
 0x460   : > { %4075 = vrcp.f32 %v2029_v22  ;;  %v2032_v16 = vpop.xlane.xlu0 %2031  ;;  %2287 = vmatprep.subr.bf16.mxu0 %v3917_v40 }
 0x461   : > { %4077 = vrcp.f32 %v2032_v16 }
 0x463   : > { %v2035_v45 = vpop.xlane.xlu1 %2034 }
 0x464   : > { %4079 = vrcp.f32 %v2035_v45  ;;  %v2038_v46 = vpop.xlane.xlu0 %2037 }
 0x465   : > { %4081 = vrcp.f32 %v2038_v46  ;;  %v4070_v29 = vpop.eup %4069 }
 0x466   : > { %v2050_v37 = vmul.f32 %v4070_v29, %v5150_v18  ;;  %v3920_v18 = vld [vmem:[%s5802_s10 + $0x64] ss:$8 sps:$4 sm:$0xff]  }
 0x467   : > { %v2041_v13 = vpop.xlane.xlu1 %2040 }
 0x468   : > { %4083 = vrcp.f32 %v2041_v13 }
 0x469   : > { %v4072_v11 = vpop.eup %4071 }
 0x46a   : > { %v2051_v7 = vmul.f32 %v4072_v11, %v5154_v41  ;;  %v4074_v53 = vpop.eup %4073 }
 0x46b   : > { %v2052_v20 = vmul.f32 %v4074_v53, %v5156_v6 }
 0x46c   : > { %v2058_v23 = vpack.c.bf16 %v2051_v7, %v2050_v37 }
 0x46d   : > { %v4076_v58 = vpop.eup %4075 }
 0x46e   : > { %v2053_v25 = vmul.f32 %v4076_v58, %v5162_v3  ;;  %3766 = vmatprep.mubr.msk.bf16.mxu0 %vm1445_vm6, %v2058_v23  ;;  %v4078_v1 = vpop.eup %4077  ;;  %v3941_v58 = vld [vmem:[%s5803_s11 + $0x70] sm:$0xff]  }
 0x46f   : > { %v2054_v55 = vmul.f32 %v4078_v1, %v5164_v36 }
 0x470   : > { %v2059_v14 = vpack.c.bf16 %v2053_v25, %v2052_v20 }
 0x471   : > { %v4080_v41 = vpop.eup %4079 }
 0x472   : > { %3767 = vmatmul.mubr.msk.bf16.vlgmr.msra.gmra.mxu0 %vm1445_vm6, %v2059_v14  ;;  %v2055_v6 = vmul.f32 %v4080_v41, %v5170_v57  ;;  %v4082_v3 = vpop.eup %4081  ;;  %v3921_v57 = vld [vmem:[%s5802_s10 + $0x50] ss:$8 sps:$4 sm:$0xff]  }
 0x473   : > { %2288 = vmatpush1.bf16.msra.mxu0 %v3915_v12  ;;  %v2056_v54 = vmul.f32 %v4082_v3, %v5172_v24  ;;  %v3924_v24 = vld [vmem:[%s5802_s10 + $0x40] ss:$8 sps:$4 sm:$0xff]  }
 0x474   : > { %2289 = vmatprep.subr.bf16.mxu0 %v3920_v18  ;;  %v2060_v19 = vpack.c.bf16 %v2055_v6, %v2054_v55 }
 0x475   : > { %v4084_v59 = vpop.eup %4083 }
 0x476   : > { %3770 = vmatprep.mubr.msk.bf16.mxu0 %vm1445_vm6, %v2060_v19  ;;  %v2057_v36 = vmul.f32 %v4084_v59, %v5178_v60  ;;  %v3929_v60 = vld [vmem:[%s5802_s10 + $0x34] ss:$8 sps:$4 sm:$0xff]  }
 0x477   : > { %2290 = vmatpush1.bf16.msra.mxu0 %v3918_v49 }
 0x478   : > { %2291 = vmatprep.subr.bf16.mxu0 %v3923_v50  ;;  %v2061_v34 = vpack.c.bf16 %v2057_v36, %v2056_v54 }
 0x47a   : > { %3771 = vmatmul.mubr.msk.bf16.gmra.mxu0 %vm1445_vm6, %v2061_v34 }
 0x47b   : > { %2292 = vmatpush1.bf16.msra.mxu0 %v3921_v57  ;;  %2319 = vmatprep.mubr.bf16.mxu0 %v4197_v48 }
 0x47c   : > { %2293 = vmatprep.subr.bf16.mxu0 %v3926_v56 }
 0x47f   : > { %2294 = vmatpush1.bf16.msra.mxu0 %v3924_v24 }
 0x480   : > { %2295 = vmatprep.subr.bf16.mxu0 %v3929_v60 }
 0x483   : > { %2296 = vmatpush1.bf16.msra.mxu0 %v3927_v43 }
 0x484   : > { %2297 = vmatprep.subr.bf16.mxu0 %v3932_v61 }
 0x487   : > { %2298 = vmatpush1.bf16.msra.mxu0 %v3930_v10 }
 0x488   : > { %2299 = vmatprep.subr.bf16.mxu0 %v3935_v26 }
 0x48b   : > { %2300 = vmatpush1.bf16.msra.mxu0 %v3933_v35 }
 0x48c   : > { %2301 = vmatprep.subr.bf16.mxu0 %v3938_v62 }
 0x48f   : > { %2302 = vmatpush1.bf16.msra.mxu0 %v3936_v2 }
 0x492   : > { %2320 = vmatmul.mubr.bf16.vlgmr.msra.gmra.mxu0 %v4759_v39 }
 0x493   : > { %2329 = vmatprep.mubr.bf16.mxu0 %v4197_v48 }
 0x49a   : > { %2330 = vmatmul.mubr.bf16.gmra.mxu0 %v4825_v27 }
 0x49b   : > { %2339 = vmatprep.mubr.bf16.mxu0 %v4197_v48 }
 0x4a2   : > { %2340 = vmatmul.mubr.bf16.gmra.mxu0 %v4829_v8 }
 0x4a3   : > { %2349 = vmatprep.mubr.bf16.mxu0 %v4197_v48 }
 0x4aa   : > { %2350 = vmatmul.mubr.bf16.gmra.mxu0 %v4857_v63 }
 0x4f1   : > { %v5289_v17 = vpop.f32.mrf.mxu0 }
 0x4f3   : > { %v5291_v52 = vpop.f32.mrf.mxu0 }
 0x4f5   : > { %v5293_v9 = vpop.f32.mrf.mxu0 }
 0x4f7   : > { %v5297_v28 = vpop.f32.mrf.mxu0 }
 0x4f9   : > { %v5301_v21 = vpop.f32.mrf.mxu0 }
 0x4fb   : > { %v5303_v8 = vpop.f32.mrf.mxu0 }
 0x4fd   : > { %v5305_v48 = vpop.f32.mrf.mxu0 }
 0x4ff   : > { %v5309_v47 = vpop.f32.mrf.mxu0 }
 0x512   : > { %v5313_v33 = vpop.f32.mrf.mxu0 }
 0x514   : > { %v5315_v0 = vpop.f32.mrf.mxu0 }
 0x516   : > { %v5317_v30 = vpop.f32.mrf.mxu0 }
 0x518   : > { %v5321_v22 = vpop.f32.mrf.mxu0 }
 0x51a   : > { %v5325_v45 = vpop.f32.mrf.mxu0 }
 0x51c   : > { %v5327_v46 = vpop.f32.mrf.mxu0 }
 0x51e   : > { %v5329_v29 = vpop.f32.mrf.mxu0 }
 0x520   : > { %v5333_v11 = vpop.f32.mrf.mxu0 }
 0x532   : > { %v5337_v7 = vpop.f32.mrf.mxu0 }
 0x534   : > { %v5339_v53 = vpop.f32.mrf.mxu0 }
 0x536   : > { %v5341_v23 = vpop.f32.mrf.mxu0 }
 0x538   : > { %v5345_v20 = vpop.f32.mrf.mxu0 }
 0x53a   : > { %v5349_v1 = vpop.f32.mrf.mxu0 }
 0x53c   : > { %v5351_v12 = vpop.f32.mrf.mxu0 }
 0x53e   : > { %v5353_v14 = vpop.f32.mrf.mxu0 }
 0x540   : > { %v5357_v41 = vpop.f32.mrf.mxu0 }
 0x552   : > { %v2321_v6 = vpop.f32.mrf.mxu0 }
 0x554   : > { %v2323_v3 = vpop.f32.mrf.mxu0 }
 0x555   : > { %v2360_v49 = vmax.f32 %v2321_v6, %v2323_v3 }
 0x556   : > { %v2325_v19 = vpop.f32.mrf.mxu0 }
 0x557   : > { %2361 = vmax.xlane.f32.xlu0 %v2360_v49 }
 0x558   : > { %v2327_v50 = vpop.f32.mrf.mxu0 }
 0x559   : > { %v2363_v59 = vmax.f32 %v2325_v19, %v2327_v50 }
 0x55a   : > { %v2331_v54 = vpop.f32.mrf.mxu0 }
 0x55b   : > { %2364 = vmax.xlane.f32.xlu1 %v2363_v59 }
 0x55c   : > { %v2333_v36 = vpop.f32.mrf.mxu0 }
 0x55d   : > { %v2366_v57 = vmax.f32 %v2331_v54, %v2333_v36 }
 0x55e   : > { %v2335_v34 = vpop.f32.mrf.mxu0 }
 0x55f   : > { %2367 = vmax.xlane.f32.xlu0 %v2366_v57 }
 0x560   : > { %v2337_v56 = vpop.f32.mrf.mxu0 }
 0x561   : > { %v2369_v24 = vmax.f32 %v2335_v34, %v2337_v56 }
 0x562   : > { %v2341_v60 = vpop.f32.mrf.mxu0 }
 0x563   : > { %2370 = vmax.xlane.f32.xlu1 %v2369_v24 }
 0x564   : > { %v2343_v43 = vpop.f32.mrf.mxu0 }
 0x565   : > { %v2372_v61 = vmax.f32 %v2341_v60, %v2343_v43 }
 0x566   : > { %v5361_v10 = vpop.f32.mrf.mxu0 }
 0x567   : > { %2373 = vmax.xlane.f32.xlu0 %v2372_v61  ;;  %v3939_v61 = vld [vmem:[%s5803_s11 + $0x78] sm:$0xff]  }
 0x568   : > { %v5363_v26 = vpop.f32.mrf.mxu0  ;;  %3499 = vmatprep.subr.bf16.mxu1 %v3939_v61 }
 0x569   : > { %v2375_v35 = vmax.f32 %v5361_v10, %v5363_v26 }
 0x56a   : > { %v5367_v62 = vpop.f32.mrf.mxu0 }
 0x56b   : > { %2376 = vmax.xlane.f32.xlu1 %v2375_v35  ;;  %v3940_v35 = vld [vmem:[%s5803_s11 + $0x38] sm:$0xff]  }
 0x56c   : > { %v5369_v2 = vpop.f32.mrf.mxu0  ;;  %3500 = vmatpush3.bf16.msra.mxu1 %v3940_v35 }
 0x56d   : > { %v2378_v49 = vmax.f32 %v5367_v62, %v5369_v2  ;;  %3501 = vmatprep.subr.bf16.mxu1 %v3941_v58 }
 0x56e   : > { %v5373_v59 = vpop.f32.mrf.mxu0 }
 0x56f   : > { %2379 = vmax.xlane.f32.xlu0 %v2378_v49  ;;  %v3942_v49 = vld [vmem:[%s5803_s11 + $0x30] sm:$0xff]  }
 0x570   : > { %v5375_v57 = vpop.f32.mrf.mxu0  ;;  %3502 = vmatpush3.bf16.msra.mxu1 %v3942_v49 }
 0x571   : > { %v2381_v24 = vmax.f32 %v5373_v59, %v5375_v57 }
 0x573   : > { %2382 = vmax.xlane.f32.xlu1 %v2381_v24  ;;  %v3943_v24 = vld [vmem:[%s5803_s11 + $0x68] sm:$0xff]  }
 0x574   : > { %3503 = vmatprep.subr.bf16.mxu1 %v3943_v24 }
 0x5e0   : > { %v2362_v25 = vpop.xlane.xlu0 %2361 }
 0x5e1   : > { %v2384_v18 = vsub.f32 %v2321_v6, %v2362_v25  ;;  %v2385_v55 = vsub.f32 %v2323_v3, %v2362_v25 }
 0x5e3   : > { %v2400_v63 = vmul.f32 1.442695, %v2384_v18  ;;  %v2402_v13 = vmul.f32 1.442695, %v2385_v55 }
 0x5e4   : > { %v2365_v31 = vpop.xlane.xlu1 %2364 }
 0x5e5   : > { %4085 = vpow2.f32 %v2400_v63  ;;  %v2386_v61 = vsub.f32 %v2325_v19, %v2365_v31  ;;  %v2387_v35 = vsub.f32 %v2327_v50, %v2365_v31 }
 0x5e6   : > { %4087 = vpow2.f32 %v2402_v13 }
 0x5e7   : > { %v2404_v37 = vmul.f32 1.442695, %v2386_v61  ;;  %v2406_v39 = vmul.f32 1.442695, %v2387_v35 }
 0x5e8   : > { %v2368_v40 = vpop.xlane.xlu0 %2367 }
 0x5e9   : > { %4089 = vpow2.f32 %v2404_v37  ;;  %v2388_v58 = vsub.f32 %v2331_v54, %v2368_v40  ;;  %v2389_v27 = vsub.f32 %v2333_v36, %v2368_v40 }
 0x5ea   : > { %4091 = vpow2.f32 %v2406_v39 }
 0x5eb   : > { %v2408_v16 = vmul.f32 1.442695, %v2388_v58  ;;  %v2410_v49 = vmul.f32 1.442695, %v2389_v27 }
 0x5ec   : > { %v2371_v24 = vpop.xlane.xlu1 %2370 }
 0x5ed   : > { %4093 = vpow2.f32 %v2408_v16  ;;  %v2390_v6 = vsub.f32 %v2335_v34, %v2371_v24  ;;  %v2391_v25 = vsub.f32 %v2337_v56, %v2371_v24 }
 0x5ee   : > { %4095 = vpow2.f32 %v2410_v49 }
 0x5ef   : > { %v2412_v18 = vmul.f32 1.442695, %v2390_v6  ;;  %v2414_v55 = vmul.f32 1.442695, %v2391_v25 }
 0x5f0   : > { %v2374_v63 = vpop.xlane.xlu0 %2373 }
 0x5f1   : > { %4097 = vpow2.f32 %v2412_v18  ;;  %v2392_v31 = vsub.f32 %v2341_v60, %v2374_v63  ;;  %v2393_v13 = vsub.f32 %v2343_v43, %v2374_v63 }
 0x5f2   : > { %v5394_v3 = vpop.eup %4085  ;;  %4099 = vpow2.f32 %v2414_v55 }
 0x5f3   : > { %v5396_v37 = vpop.eup %4087  ;;  %v2416_v40 = vmul.f32 1.442695, %v2392_v31  ;;  %v2418_v39 = vmul.f32 1.442695, %v2393_v13  ;;  %v3944_v13 = vld [vmem:[%s5803_s11 + $0x28] sm:$0xff]  }
 0x5f4   : > { %v2377_v19 = vpop.xlane.xlu1 %2376  ;;  %v2432_v27 = vadd.f32 %v5396_v37, %v5394_v3  ;;  %3504 = vmatpush3.bf16.msra.mxu1 %v3944_v13  ;;  %v3979_v13 = vld [vmem:[%s5800_s8 + $0x38] sm:$0xff]  }
 0x5f5   : > { %4101 = vpow2.f32 %v2416_v40  ;;  %v2394_v16 = vsub.f32 %v5361_v10, %v2377_v19  ;;  %v2395_v50 = vsub.f32 %v5363_v26, %v2377_v19  ;;  %v3946_v19 = vld [vmem:[%s5803_s11 + $0x20] sm:$0xff]   ;;  %3774 = vmatprep.subr.bf16.mxu0 %v3979_v13 }
 0x5f6   : > { %v5402_v54 = vpop.eup %4089  ;;  %4103 = vpow2.f32 %v2418_v39  ;;  %2433 = vadd.xlane.f32.xlu0 %v2432_v27  ;;  %v3947_v27 = vld [vmem:[%s5803_s11 + $0x58] sm:$0xff]   ;;  %3775 = vmatpush3.bf16.msra.mxu0 %v3979_v13 }
 0x5f7   : > { %v5404_v36 = vpop.eup %4091  ;;  %v2420_v34 = vmul.f32 1.442695, %v2394_v16  ;;  %v2422_v56 = vmul.f32 1.442695, %v2395_v50 }
 0x5f8   : > { %v2380_v60 = vpop.xlane.xlu0 %2379  ;;  %v2435_v43 = vadd.f32 %v5404_v36, %v5402_v54 }
 0x5f9   : > { %4105 = vpow2.f32 %v2420_v34  ;;  %v2396_v61 = vsub.f32 %v5367_v62, %v2380_v60  ;;  %v2397_v35 = vsub.f32 %v5369_v2, %v2380_v60  ;;  %v3949_v60 = vld [vmem:[%s5803_s11 + $0x50] sm:$0xff]  }
 0x5fa   : > { %v5410_v10 = vpop.eup %4093  ;;  %4107 = vpow2.f32 %v2422_v56  ;;  %2436 = vadd.xlane.f32.xlu1 %v2435_v43  ;;  %v3948_v56 = vld [vmem:[%s5803_s11 + $0x18] sm:$0xff]  }
 0x5fb   : > { %v5412_v26 = vpop.eup %4095  ;;  %v2424_v58 = vmul.f32 1.442695, %v2396_v61  ;;  %v2426_v49 = vmul.f32 1.442695, %v2397_v35 }
 0x5fc   : > { %v2383_v24 = vpop.xlane.xlu1 %2382  ;;  %v2438_v6 = vadd.f32 %v5412_v26, %v5410_v10 }
 0x5fd   : > { %4109 = vpow2.f32 %v2424_v58  ;;  %v2398_v25 = vsub.f32 %v5373_v59, %v2383_v24  ;;  %v2399_v18 = vsub.f32 %v5375_v57, %v2383_v24  ;;  %v3945_v59 = vld [vmem:[%s5803_s11 + $0x60] sm:$0xff]   ;;  %v3950_v58 = vld [vmem:[%s5803_s11 + $0x10] sm:$0xff]  }
 0x5fe   : > { %v5418_v62 = vpop.eup %4097  ;;  %4111 = vpow2.f32 %v2426_v49  ;;  %2439 = vadd.xlane.f32.xlu0 %v2438_v6  ;;  %3505 = vmatprep.subr.bf16.mxu1 %v3945_v59  ;;  %v3951_v49 = vld [vmem:[%s5803_s11 + $0x48] sm:$0xff]   ;;  %v3980_v59 = vld [vmem:[%s5800_s8 + $0x30] sm:$0xff]  }
 0x5ff   : > { %v5420_v2 = vpop.eup %4099  ;;  %v2428_v55 = vmul.f32 1.442695, %v2398_v25  ;;  %v2430_v63 = vmul.f32 1.442695, %v2399_v18  ;;  %3506 = vmatpush3.bf16.msra.mxu1 %v3946_v19  ;;  %v3952_v18 = vld [vmem:[%s5803_s11 + $0x8] sm:$0xff]   ;;  %3776 = vmatprep.subr.bf16.mxu0 %v3980_v59  ;;  %v3982_v19 = vld [vmem:[%s5800_s8 + $0x20] sm:$0xff]  }
 0x600   : > { %v2441_v31 = vadd.f32 %v5420_v2, %v5418_v62  ;;  %3507 = vmatprep.subr.bf16.mxu1 %v3947_v27  ;;  %3777 = vmatpush3.bf16.msra.mxu0 %v3980_v59 }
 0x601   : > { %4113 = vpow2.f32 %v2428_v55  ;;  %v3953_v55 = vld [vmem:[%s5803_s11 + $0x40] sm:$0xff]  }
 0x602   : > { %v5430_v57 = vpop.eup %4101  ;;  %4115 = vpow2.f32 %v2430_v63  ;;  %2442 = vadd.xlane.f32.xlu1 %v2441_v31  ;;  %v3954_v63 = vld [vmem:[%s5803_s11] sm:$0xff]   ;;  %v3955_v31 = vld [vmem:[%s5799_s7 + $0x78] sm:$0xff]  }
 0x603   : > { %v5432_v40 = vpop.eup %4103  ;;  %3508 = vmatpush3.bf16.msra.mxu1 %v3948_v56 }
 0x604   : > { %v2444_v39 = vadd.f32 %v5432_v40, %v5430_v57  ;;  %3509 = vmatprep.subr.bf16.mxu1 %v3949_v60 }
 0x606   : > { %v5442_v16 = vpop.eup %4105  ;;  %2445 = vadd.xlane.f32.xlu0 %v2444_v39  ;;  %v3981_v39 = vld [vmem:[%s5800_s8 + $0x28] sm:$0xff]  }
 0x607   : > { %v5444_v50 = vpop.eup %4107  ;;  %3510 = vmatpush3.bf16.msra.mxu1 %v3950_v58  ;;  %3778 = vmatprep.subr.bf16.mxu0 %v3981_v39 }
 0x608   : > { %v2447_v34 = vadd.f32 %v5444_v50, %v5442_v16  ;;  %3511 = vmatprep.subr.bf16.mxu1 %v3951_v49  ;;  %3779 = vmatpush3.bf16.msra.mxu0 %v3981_v39  ;;  %v3956_v39 = vld [vmem:[%s5799_s7 + $0x38] sm:$0xff]  }
 0x609   : > { %3780 = vmatprep.subr.bf16.mxu0 %v3982_v19 }
 0x60a   : > { %v5454_v43 = vpop.eup %4109  ;;  %2448 = vadd.xlane.f32.xlu1 %v2447_v34 }
 0x60b   : > { %v5456_v61 = vpop.eup %4111  ;;  %3512 = vmatpush3.bf16.msra.mxu1 %v3952_v18 }
 0x60c   : > { %v2450_v35 = vadd.f32 %v5456_v61, %v5454_v43  ;;  %3513 = vmatprep.subr.bf16.mxu1 %v3953_v55  ;;  %3781 = vmatpush3.bf16.msra.mxu0 %v3982_v19  ;;  %v3957_v19 = vld [vmem:[%s5799_s7 + $0x70] sm:$0xff]  }
 0x60e   : > { %v5466_v24 = vpop.eup %4113  ;;  %2451 = vadd.xlane.f32.xlu0 %v2450_v35 }
 0x60f   : > { %v5468_v6 = vpop.eup %4115  ;;  %3514 = vmatpush3.bf16.msra.mxu1 %v3954_v63 }
 0x610   : > { %v2453_v25 = vadd.f32 %v5468_v6, %v5466_v24  ;;  %3551 = vmatprep.subr.bf16.mxu1 %v3955_v31 }
 0x612   : > { %2454 = vadd.xlane.f32.xlu1 %v2453_v25 }
 0x67f   : > { %v2434_v27 = vpop.xlane.xlu0 %2433 }
 0x680   : > { %4117 = vrcp.f32 %v2434_v27 }
 0x683   : > { %v2437_v34 = vpop.xlane.xlu1 %2436 }
 0x684   : > { %4119 = vrcp.f32 %v2437_v34  ;;  %v3959_v34 = vld [vmem:[%s5799_s7 + $0x68] sm:$0xff]  }
 0x687   : > { %v2440_v56 = vpop.xlane.xlu0 %2439 }
 0x688   : > { %4121 = vrcp.f32 %v2440_v56 }
 0x68b   : > { %v2443_v60 = vpop.xlane.xlu1 %2442 }
 0x68c   : > { %4123 = vrcp.f32 %v2443_v60 }
 0x68d   : > { %v4118_v35 = vpop.eup %4117 }
 0x68e   : > { %v2465_v25 = vmul.f32 %v4118_v35, %v5396_v37  ;;  %v2464_v55 = vmul.f32 %v4118_v35, %v5394_v3  ;;  %v3958_v3 = vld [vmem:[%s5799_s7 + $0x30] sm:$0xff]  }
 0x68f   : > { %v2446_v58 = vpop.xlane.xlu0 %2445 }
 0x690   : > { %4125 = vrcp.f32 %v2446_v58 }
 0x691   : > { %v4120_v49 = vpop.eup %4119 }
 0x692   : > { %v2467_v18 = vmul.f32 %v4120_v49, %v5404_v36  ;;  %v2466_v63 = vmul.f32 %v4120_v49, %v5402_v54 }
 0x693   : > { %v2449_v31 = vpop.xlane.xlu1 %2448 }
 0x694   : > { %4127 = vrcp.f32 %v2449_v31  ;;  %v2481_v13 = vpack.c.bf16 %v2467_v18, %v2465_v25  ;;  %v2480_v59 = vpack.c.bf16 %v2466_v63, %v2464_v55  ;;  %v3961_v18 = vld [vmem:[%s5799_s7 + $0x60] sm:$0xff]   ;;  %v3963_v55 = vld [vmem:[%s5799_s7 + $0x58] sm:$0xff]  }
 0x695   : > { %v4122_v37 = vpop.eup %4121 }
 0x696   : > { %2648 = vmatprep.mubr.bf16.mxu1 %v2481_v13  ;;  %v2469_v36 = vmul.f32 %v4122_v37, %v5412_v26  ;;  %v2468_v60 = vmul.f32 %v4122_v37, %v5410_v10  ;;  %v3960_v26 = vld [vmem:[%s5799_s7 + $0x28] sm:$0xff]   ;;  %v3962_v10 = vld [vmem:[%s5799_s7 + $0x20] sm:$0xff]   ;;  %v3964_v37 = vld [vmem:[%s5799_s7 + $0x18] sm:$0xff]  }
 0x697   : > { %v2452_v27 = vpop.xlane.xlu0 %2451  ;;  %2649 = vmatmul.mubr.bf16.vlgmr.msra.gmra.mxu1 %v2480_v59 }
 0x698   : > { %3552 = vmatpush3.bf16.msra.mxu1 %v3956_v39  ;;  %4129 = vrcp.f32 %v2452_v27  ;;  %v3965_v27 = vld [vmem:[%s5799_s7 + $0x50] sm:$0xff]  }
 0x699   : > { %v4124_v54 = vpop.eup %4123  ;;  %3553 = vmatprep.subr.bf16.mxu1 %v3957_v19 }
 0x69a   : > { %v2471_v56 = vmul.f32 %v4124_v54, %v5420_v2  ;;  %v2470_v35 = vmul.f32 %v4124_v54, %v5418_v62 }
 0x69b   : > { %v2455_v58 = vpop.xlane.xlu1 %2454 }
 0x69c   : > { %4131 = vrcp.f32 %v2455_v58  ;;  %3554 = vmatpush3.bf16.msra.mxu1 %v3958_v3  ;;  %v2483_v49 = vpack.c.bf16 %v2471_v56, %v2469_v36  ;;  %v2482_v25 = vpack.c.bf16 %v2470_v35, %v2468_v60  ;;  %v3968_v35 = vld [vmem:[%s5799_s7 + $0x8] sm:$0xff]   ;;  %v3969_v58 = vld [vmem:[%s5799_s7 + $0x40] sm:$0xff]  }
 0x69d   : > { %3555 = vmatprep.subr.bf16.mxu1 %v3959_v34  ;;  %v4126_v2 = vpop.eup %4125 }
 0x69e   : > { %2656 = vmatprep.mubr.bf16.mxu1 %v2483_v49  ;;  %v2473_v63 = vmul.f32 %v4126_v2, %v5432_v40  ;;  %v2472_v13 = vmul.f32 %v4126_v2, %v5430_v57  ;;  %v3966_v57 = vld [vmem:[%s5799_s7 + $0x10] sm:$0xff]   ;;  %v5582_v49 = vld [vmem:[%s5799_s7 + $0xa8] sm:$0xff]  }
 0x69f   : > { %2657 = vmatmul.mubr.bf16.gmra.mxu1 %v2482_v25  ;;  %v3983_v25 = vld [vmem:[%s5800_s8 + $0x18] sm:$0xff]  }
 0x6a0   : > { %3556 = vmatpush3.bf16.msra.mxu1 %v3960_v26  ;;  %3782 = vmatprep.subr.bf16.mxu0 %v3983_v25 }
 0x6a1   : > { %v4128_v62 = vpop.eup %4127  ;;  %3557 = vmatprep.subr.bf16.mxu1 %v3961_v18  ;;  %3783 = vmatpush3.bf16.msra.mxu0 %v3983_v25 }
 0x6a2   : > { %v2475_v31 = vmul.f32 %v4128_v62, %v5444_v50  ;;  %v2474_v59 = vmul.f32 %v4128_v62, %v5442_v16  ;;  %v3967_v50 = vld [vmem:[%s5799_s7 + $0x48] sm:$0xff]  }
 0x6a4   : > { %3558 = vmatpush3.bf16.msra.mxu1 %v3962_v10  ;;  %v2485_v39 = vpack.c.bf16 %v2475_v31, %v2473_v63  ;;  %v2484_v19 = vpack.c.bf16 %v2474_v59, %v2472_v13 }
 0x6a5   : > { %3559 = vmatprep.subr.bf16.mxu1 %v3963_v55  ;;  %v4130_v40 = vpop.eup %4129 }
 0x6a6   : > { %2664 = vmatprep.mubr.bf16.mxu1 %v2485_v39  ;;  %v2477_v3 = vmul.f32 %v4130_v40, %v5456_v61  ;;  %v2476_v36 = vmul.f32 %v4130_v40, %v5454_v43  ;;  %v5816_v43 = vpack.c.bf16 %v5321_v22, %v5315_v0  ;;  %v3970_v61 = vld [vmem:[%s5799_s7] sm:$0xff]   ;;  %v5817_v0 = vpack.c.bf16 %v5297_v28, %v5291_v52 }
 0x6a7   : > { %2665 = vmatmul.mubr.bf16.gmra.mxu1 %v2484_v19  ;;  %v5818_v22 = vpack.c.bf16 %v5317_v30, %v5313_v33  ;;  %v5589_v52 = vld [vmem:[%s5799_s7 + $0xa0] sm:$0xff]   ;;  %v5819_v28 = vpack.c.bf16 %v5293_v9, %v5289_v17  ;;  %v5820_v33 = vpack.c.bf16 %v5333_v11, %v5327_v46  ;;  %v5602_v30 = vld [vmem:[%s5799_s7 + $0x98] sm:$0xff]   ;;  %v5609_v17 = vld [vmem:[%s5799_s7 + $0x90] sm:$0xff]   ;;  %v5821_v9 = vpack.c.bf16 %v5309_v47, %v5303_v8 }
 0x6a8   : > { %3560 = vmatpush3.bf16.msra.mxu1 %v3964_v37  ;;  %v5822_v46 = vpack.c.bf16 %v5329_v29, %v5325_v45  ;;  %v5622_v11 = vld [vmem:[%s5799_s7 + $0x88] sm:$0xff]   ;;  %v5629_v8 = vld [vmem:[%s5799_s7 + $0x80] sm:$0xff]   ;;  %v5823_v47 = vpack.c.bf16 %v5305_v48, %v5301_v21  ;;  %v5824_v45 = vpack.c.bf16 %v5357_v41, %v5351_v12  ;;  %v5825_v29 = vpack.c.bf16 %v5353_v14, %v5349_v1  ;;  %v3984_v21 = vld [vmem:[%s5800_s8 + $0x10] sm:$0xff]  }
 0x6a9   : > { %v4132_v16 = vpop.eup %4131  ;;  %3561 = vmatprep.subr.bf16.mxu1 %v3965_v27  ;;  %3784 = vmatprep.subr.bf16.mxu0 %v3984_v21  ;;  %v3985_v48 = vld [vmem:[%s5800_s8 + $0x8] sm:$0xff]   ;;  %v3986_v1 = vld [vmem:[%s5800_s8] sm:$0xff]  }
 0x6aa   : > { %v2479_v54 = vmul.f32 %v4132_v16, %v5468_v6  ;;  %v2478_v34 = vmul.f32 %v4132_v16, %v5466_v24  ;;  %v5563_v24 = vld [vmem:[%s5799_s7 + $0xb8] sm:$0xff]   ;;  %v5569_v6 = vld [vmem:[%s5799_s7 + $0xb0] sm:$0xff]   ;;  %3785 = vmatpush3.bf16.msra.mxu0 %v3984_v21 }
 0x6ab   : > { %3786 = vmatprep.subr.bf16.mxu0 %v3985_v48 }
 0x6ac   : > { %3562 = vmatpush3.bf16.msra.mxu1 %v3966_v57  ;;  %v2487_v56 = vpack.c.bf16 %v2479_v54, %v2477_v3  ;;  %v2486_v60 = vpack.c.bf16 %v2478_v34, %v2476_v36 }
 0x6ad   : > { %3563 = vmatprep.subr.bf16.mxu1 %v3967_v50 }
 0x6ae   : > { %2672 = vmatprep.mubr.bf16.mxu1 %v2487_v56  ;;  %3787 = vmatpush3.bf16.msra.mxu0 %v3985_v48 }
 0x6af   : > { %2673 = vmatmul.mubr.bf16.gmra.mxu1 %v2486_v60  ;;  %3788 = vmatprep.subr.bf16.mxu0 %v3986_v1 }
 0x6b0   : > { %3564 = vmatpush3.bf16.msra.mxu1 %v3968_v35  ;;  %3037 = vmatprep.mubr.bf16.mxu1 %v5816_v43 }
 0x6b1   : > { %3565 = vmatprep.subr.bf16.mxu1 %v3969_v58 }
 0x6b2   : > { %3789 = vmatpush3.bf16.msra.mxu0 %v3986_v1 }
 0x6b3   : > { %3798 = vmatprep.subr.bf16.mxu0 %v5563_v24 }
 0x6b4   : > { %3566 = vmatpush3.bf16.msra.mxu1 %v3970_v61 }
 0x6b5   : > { %3822 = vmatprep.subr.bf16.mxu1 %v5563_v24 }
 0x6b7   : > { %3038 = vmatmul.mubr.bf16.vlgmr.msra.gmra.mxu1 %v5817_v0 }
 0x6b8   : > { %3045 = vmatprep.mubr.bf16.mxu1 %v5818_v22  ;;  %3830 = vmatpush3.bf16.msra.mxu1 %v5563_v24 }
 0x6b9   : > { %3823 = vmatprep.subr.bf16.mxu1 %v5569_v6 }
 0x6bc   : > { %3831 = vmatpush3.bf16.msra.mxu1 %v5569_v6 }
 0x6bd   : > { %3824 = vmatprep.subr.bf16.mxu1 %v5582_v49 }
 0x6bf   : > { %3046 = vmatmul.mubr.bf16.gmra.mxu1 %v5819_v28 }
 0x6c0   : > { %3053 = vmatprep.mubr.bf16.mxu1 %v5820_v33  ;;  %3832 = vmatpush3.bf16.msra.mxu1 %v5582_v49 }
 0x6c1   : > { %3825 = vmatprep.subr.bf16.mxu1 %v5589_v52 }
 0x6c4   : > { %3833 = vmatpush3.bf16.msra.mxu1 %v5589_v52 }
 0x6c5   : > { %3826 = vmatprep.subr.bf16.mxu1 %v5602_v30 }
 0x6c7   : > { %3054 = vmatmul.mubr.bf16.gmra.mxu1 %v5821_v9 }
 0x6c8   : > { %3061 = vmatprep.mubr.bf16.mxu1 %v5822_v46  ;;  %3834 = vmatpush3.bf16.msra.mxu1 %v5602_v30 }
 0x6c9   : > { %3827 = vmatprep.subr.bf16.mxu1 %v5609_v17 }
 0x6cc   : > { %3835 = vmatpush3.bf16.msra.mxu1 %v5609_v17 }
 0x6cd   : > { %3828 = vmatprep.subr.bf16.mxu1 %v5622_v11 }
 0x6cf   : > { %3062 = vmatmul.mubr.bf16.gmra.mxu1 %v5823_v47 }
 0x6d0   : > { %3836 = vmatpush3.bf16.msra.mxu1 %v5622_v11  ;;  %3818 = vmatprep.mubr.bf16.mxu1 %v5824_v45 }
 0x6d1   : > { %3829 = vmatprep.subr.bf16.mxu1 %v5629_v8 }
 0x6d4   : > { %3837 = vmatpush3.bf16.msra.mxu1 %v5629_v8 }
 0x6d7   : > { %3819 = vmatmul.mubr.bf16.vlgmr.msra.gmra.mxu1 %v5825_v29 }
 0x757   : > { %v3515_v12 = vpop.f32.mrf.mxu1 }
 0x759   : > { %v3516_v14 = vpop.f32.mrf.mxu1 }
 0x75a   : > { %v3517_v41 = vadd.f32 %v3516_v14, %v3515_v12 }
 0x75b   : > { %v3518_v26 = vpop.f32.mrf.mxu1 }
 0x75c   : > { %v2681_v18 = vsub.f32 %v4750_v32, %v3517_v41 }
 0x75d   : > { %v3519_v2 = vpop.f32.mrf.mxu1 }
 0x75e   : > { %v3520_v10 = vadd.f32 %v3519_v2, %v3518_v26  ;;  %v2689_v62 = vand.u32 2147483647, %v2681_v18 }
 0x75f   : > { %v3521_v55 = vpop.f32.mrf.mxu1 }
 0x760   : > { %v2728_v63 = vpack.c.bf16 %v3520_v10, %v3517_v41  ;;  %2697 = vadd.xlane.f32.xlu0 %v2689_v62  ;;  %v2682_v31 = vsub.f32 %v4753_v5, %v3520_v10 }
 0x761   : > { %v3522_v13 = vpop.f32.mrf.mxu1 }
 0x762   : > { %v3523_v59 = vadd.f32 %v3522_v13, %v3521_v55  ;;  %3790 = vmatprep.mubr.bf16.mxu0 %v2728_v63  ;;  %v2690_v39 = vand.u32 2147483647, %v2682_v31 }
 0x763   : > { %v3524_v19 = vpop.f32.mrf.mxu1 }
 0x764   : > { %2699 = vadd.xlane.f32.xlu1 %v2690_v39  ;;  %v2683_v37 = vsub.f32 %v4810_v4, %v3523_v59 }
 0x765   : > { %v3525_v27 = vpop.f32.mrf.mxu1 }
 0x766   : > { %v3526_v40 = vadd.f32 %v3525_v27, %v3524_v19  ;;  %v2691_v57 = vand.u32 2147483647, %v2683_v37 }
 0x767   : > { %v3527_v32 = vpop.f32.mrf.mxu1 }
 0x768   : > { %v2729_v16 = vpack.c.bf16 %v3526_v40, %v3523_v59  ;;  %2701 = vadd.xlane.f32.xlu0 %v2691_v57  ;;  %v2684_v50 = vsub.f32 %v4803_v42, %v3526_v40 }
 0x769   : > { %v3528_v3 = vpop.f32.mrf.mxu1 }
 0x76a   : > { %v3529_v54 = vadd.f32 %v3528_v3, %v3527_v32  ;;  %3791 = vmatmul.mubr.bf16.vlgmr.msra.gmra.mxu0 %v2729_v16  ;;  %v2692_v5 = vand.u32 2147483647, %v2684_v50 }
 0x76b   : > { %3799 = vmatpush3.bf16.msra.mxu0 %v5563_v24  ;;  %v3530_v36 = vpop.f32.mrf.mxu1 }
 0x76c   : > { %2703 = vadd.xlane.f32.xlu1 %v2692_v5  ;;  %3800 = vmatprep.subr.bf16.mxu0 %v5569_v6  ;;  %v2685_v4 = vsub.f32 %v4818_v51, %v3529_v54 }
 0x76d   : > { %v3531_v34 = vpop.f32.mrf.mxu1 }
 0x76e   : > { %v3532_v56 = vadd.f32 %v3531_v34, %v3530_v36  ;;  %v2693_v60 = vand.u32 2147483647, %v2685_v4 }
 0x76f   : > { %3801 = vmatpush3.bf16.msra.mxu0 %v5569_v6  ;;  %v3533_v35 = vpop.f32.mrf.mxu1 }
 0x770   : > { %v2730_v58 = vpack.c.bf16 %v3532_v56, %v3529_v54  ;;  %2705 = vadd.xlane.f32.xlu0 %v2693_v60  ;;  %3802 = vmatprep.subr.bf16.mxu0 %v5582_v49  ;;  %v2686_v42 = vsub.f32 %v4806_v44, %v3532_v56  ;;  %v5705_v60 = vld [vmem:[%s5801_s9] ss:$0 sm:$0xff] }
 0x771   : > { %v3534_v43 = vpop.f32.mrf.mxu1 }
 0x772   : > { %v3535_v61 = vadd.f32 %v3534_v43, %v3533_v35  ;;  %3794 = vmatprep.mubr.bf16.mxu0 %v2730_v58  ;;  %v2694_v24 = vand.u32 2147483647, %v2686_v42 }
 0x773   : > { %3803 = vmatpush3.bf16.msra.mxu0 %v5582_v49  ;;  %v3536_v0 = vpop.f32.mrf.mxu1  ;;  %v5826_v49 = vpack.c.bf16 %v5345_v20, %v5339_v53 }
 0x774   : > { %2707 = vadd.xlane.f32.xlu1 %v2694_v24  ;;  %3804 = vmatprep.subr.bf16.mxu0 %v5589_v52  ;;  %v2687_v51 = vsub.f32 %v4850_v15, %v3535_v61  ;;  %v3406_v24 = vld [vmem:[%s4346_s14 + $0x70] sm:$0xff] }
 0x775   : > { %v3537_v6 = vpop.f32.mrf.mxu1 }
 0x776   : > { %v3538_v22 = vadd.f32 %v3537_v6, %v3536_v0  ;;  %v2695_v28 = vand.u32 2147483647, %v2687_v51 }
 0x777   : > { %3805 = vmatpush3.bf16.msra.mxu0 %v5589_v52  ;;  %v5685_v53 = vpop.f32.mrf.mxu1 }
 0x778   : > { %v2731_v33 = vpack.c.bf16 %v3538_v22, %v3535_v61  ;;  %2709 = vadd.xlane.f32.xlu0 %v2695_v28  ;;  %3806 = vmatprep.subr.bf16.mxu0 %v5602_v30  ;;  %v2688_v44 = vsub.f32 %v4842_v38, %v3538_v22  ;;  %v5827_v38 = vpack.c.bf16 %v5341_v23, %v5337_v7 }
 0x77a   : > { %3795 = vmatmul.mubr.bf16.gmra.mxu0 %v2731_v33  ;;  %v2696_v9 = vand.u32 2147483647, %v2688_v44  ;;  %v3404_v33 = vld [vmem:[%s4346_s14 + $0x60] sm:$0xff] }
 0x77b   : > { %3807 = vmatpush3.bf16.msra.mxu0 %v5602_v30  ;;  %3814 = vmatprep.mubr.bf16.mxu0 %v5826_v49  ;;  %v5687_v30 = vpop.f32.mrf.mxu1 }
 0x77c   : > { %2711 = vadd.xlane.f32.xlu1 %v2696_v9  ;;  %3808 = vmatprep.subr.bf16.mxu0 %v5609_v17 }
 0x77f   : > { %3809 = vmatpush3.bf16.msra.mxu0 %v5609_v17 }
 0x780   : > { %3810 = vmatprep.subr.bf16.mxu0 %v5622_v11 }
 0x783   : > { %3811 = vmatpush3.bf16.msra.mxu0 %v5622_v11  ;;  %v5689_v11 = vpop.f32.mrf.mxu1 }
 0x784   : > { %3812 = vmatprep.subr.bf16.mxu0 %v5629_v8 }
 0x785   : > { %v5691_v7 = vpop.f32.mrf.mxu1 }
 0x787   : > { %3813 = vmatpush3.bf16.msra.mxu0 %v5629_v8  ;;  %v5693_v12 = vpop.f32.mrf.mxu1 }
 0x789   : > { %v3574_v26 = vpop.f32.mrf.mxu1 }
 0x78a   : > { %3815 = vmatmul.mubr.bf16.vlgmr.msra.gmra.mxu0 %v5827_v38 }
 0x78b   : > { %v5695_v10 = vpop.f32.mrf.mxu1 }
 0x78d   : > { %v3577_v63 = vpop.f32.mrf.mxu1 }
 0x78f   : > { %v3579_v13 = vpop.f32.mrf.mxu1 }
 0x791   : > { %v3580_v59 = vpop.f32.mrf.mxu1 }
 0x792   : > { %v3581_v34 = vadd.f32 %v3580_v59, %v3579_v13 }
 0x793   : > { %v3582_v39 = vpop.f32.mrf.mxu1 }
 0x795   : > { %v3583_v19 = vpop.f32.mrf.mxu1 }
 0x796   : > { %v3584_v51 = vadd.f32 %v3583_v19, %v3582_v39  ;;  %v3403_v39 = vld [vmem:[%s4346_s14 + $0x58] sm:$0xff] }
 0x797   : > { %v3585_v37 = vpop.f32.mrf.mxu1 }
 0x799   : > { %v3586_v27 = vpop.f32.mrf.mxu1 }
 0x79a   : > { %v3587_v5 = vadd.f32 %v3586_v27, %v3585_v37  ;;  %v3401_v27 = vld [vmem:[%s4346_s14 + $0x48] sm:$0xff] }
 0x79b   : > { %v3588_v57 = vpop.f32.mrf.mxu1 }
 0x79d   : > { %v3589_v16 = vpop.f32.mrf.mxu1 }
 0x79e   : > { %v3590_v58 = vadd.f32 %v3589_v16, %v3588_v57 }
 0x79f   : > { %v3820_v3 = vpop.f32.mrf.mxu1 }
 0x7a1   : > { %v3120_v36 = vpop.f32.mrf.mxu1 }
 0x7a3   : > { %v3821_v61 = vpop.f32.mrf.mxu1 }
 0x7e9   : > { %v2698_v15 = vpop.xlane.xlu0 %2697 }
 0x7ed   : > { %v2700_v20 = vpop.xlane.xlu1 %2699 }
 0x7ee   : > { %v2713_v17 = vadd.f32 %v2700_v20, %v2698_v15  ;;  %v3123_v20 = vpop.f32.mrf.mxu1 }
 0x7f1   : > { %v2702_v52 = vpop.xlane.xlu0 %2701 }
 0x7f2   : > { %v2714_v47 = vadd.f32 %v2713_v17, %v2702_v52  ;;  %v3407_v52 = vld [vmem:[%s4346_s14 + $0x78] sm:$0xff] }
 0x7f5   : > { %v2704_v46 = vpop.xlane.xlu1 %2703 }
 0x7f6   : > { %v2715_v29 = vadd.f32 %v2714_v47, %v2704_v46 }
 0x7f9   : > { %v2706_v45 = vpop.xlane.xlu0 %2705 }
 0x7fa   : > { %v2716_v8 = vadd.f32 %v2715_v29, %v2706_v45  ;;  %v3405_v45 = vld [vmem:[%s4346_s14 + $0x68] sm:$0xff] }
 0x7fd   : > { %v2708_v25 = vpop.xlane.xlu1 %2707 }
 0x7fe   : > { %v2717_v23 = vadd.f32 %v2716_v8, %v2708_v25  ;;  %v3575_v8 = vadd.f32 %v3574_v26, %v5693_v12  ;;  %v3572_v12 = vadd.f32 %v5691_v7, %v5689_v11 }
 0x801   : > { %v2710_v21 = vpop.xlane.xlu0 %2709 }
 0x802   : > { %v2718_v48 = vadd.f32 %v2717_v23, %v2710_v21  ;;  %v3569_v23 = vadd.f32 %v5687_v30, %v5685_v53  ;;  %v3400_v30 = vld [vmem:[%s4346_s14 + $0x40] sm:$0xff] }
 0x805   : > { %v2712_v1 = vpop.xlane.xlu1 %2711 }
 0x806   : > { %v2719_v14 = vadd.f32 %v2718_v48, %v2712_v1 }
 0x808   : > { %v2720_v41 = vrot.slane %v2719_v14, 4 }
 0x80a   : > { %v2721_v18 = vadd.f32 %v2720_v41, %v2719_v14  ;;  %v3578_v14 = vadd.f32 %v3577_v63, %v5695_v10 }
 0x80c   : > { %v2722_v2 = vrot.slane %v2721_v18, 2 }
 0x80e   : > { %v2723_v62 = vadd.f32 %v2722_v2, %v2721_v18  ;;  %v3402_v2 = vld [vmem:[%s4346_s14 + $0x50] sm:$0xff]  ;;  %s4133_s14 = scalar_lea.vmem %s5746_s17, 1024 }
 0x80f   : > { %p4134_p11 = scmp.ne.s32.totalorder %s5746_s17, %s4133_s14 }
 0x810   : > { %v2724_v55 = vrot.slane %v2723_v62, 1 }
 0x811   : > { %p4135_p12 = pnand %p4134_p11, %p4309_p5 }
 0x812   : > { %v2725_v31 = vadd.f32 %v2724_v55, %v2723_v62 }
 0x813   : > { %p4136_p13 = pneg %p4135_p12 }
 0x814   : > { %2727 = vst.msk [vmem:[%s447_s16] sm:$0x1] %vm2726_vm7, %v2725_v31  ;;  %s4198_s16 = smov [#allocation3]  }
 0x815   : > { %s4137_s20 = sshll.u32 %s4198_s16, 4  ;;  %s4138_s20 = int_to_ptr.vmem [resolvable:$false] %s4137_s20 }
 0x816   : > { %s4139_s21 = scalar_lea.vmem %s4138_s20, 2048  ;;  %p4140_p0 = scmp.lt.s32.totalorder %s5746_s17, %s4138_s20 }
 0x817   : > { %p4141_p1 = scmp.lt.s32.totalorder %s4139_s21, %s4133_s14 }
 0x819   : > { %p4142_p2 = por %p4141_p1, %p4140_p0 }
 0x81b   : > { %p4143_p3 = pnand %p4142_p2, %p4136_p13 }
 0x82a   : > { %v3792_v40 = vpop.f32.mrf.mxu0 }
 0x82b   : > { %v3048_v48 = vadd.f32 %v3792_v40, %v3575_v8 }
 0x82c   : > { %v2830_v32 = vpop.f32.mrf.mxu0 }
 0x82d   : > { %v3040_v41 = vadd.f32 %v3569_v23, %v2830_v32 }
 0x82e   : > { %v3793_v50 = vpop.f32.mrf.mxu0 }
 0x82f   : > { %v3051_v26 = vadd.f32 %v3793_v50, %v3578_v14 }
 0x830   : > { %v2833_v54 = vpop.f32.mrf.mxu0 }
 0x831   : > { %v3043_v13 = vadd.f32 %v3572_v12, %v2833_v54 }
 0x83a   : > { %v3796_v4 = vpop.f32.mrf.mxu0 }
 0x83b   : > { %v3064_v56 = vadd.f32 %v3796_v4, %v3587_v5 }
 0x83c   : > { %v2846_v35 = vpop.f32.mrf.mxu0 }
 0x83d   : > { %v3129_v42 = vadd.f32 %v3820_v3, %v3064_v56  ;;  %v3056_v43 = vadd.f32 %v3581_v34, %v2846_v35 }
 0x83e   : > { %v3797_v0 = vpop.f32.mrf.mxu0 }
 0x83f   : > { %v3148_v6 = vadd.f32 %v5705_v60, %v3129_v42  ;;  %v3121_v22 = vadd.f32 %v3120_v36, %v3056_v43  ;;  %v3067_v28 = vadd.f32 %v3797_v0, %v3590_v58 }
 0x840   : > { %v2849_v44 = vpop.f32.mrf.mxu0 }
 0x841   : > { %v3164_v9 = vadd.f32 %v3406_v24, %v3148_v6  ;;  %v3146_v49 = vadd.f32 %v5705_v60, %v3121_v22  ;;  %v3132_v38 = vadd.f32 %v3821_v61, %v3067_v28  ;;  %v3059_v15 = vadd.f32 %v3584_v51, %v2849_v44 }
 0x843   : > { %3172 = vst [vmem:[%s5714_s23 + $0x30] sm:$0xff] %v3164_v9  ;;  %v3162_v17 = vadd.f32 %v3404_v33, %v3146_v49  ;;  %v3149_v46 = vadd.f32 %v5705_v60, %v3132_v38  ;;  %v3124_v47 = vadd.f32 %v3123_v20, %v3059_v15 }
 0x845   : > { %3170 = vst [vmem:[%s5714_s23 + $0x20] sm:$0xff] %v3162_v17  ;;  %v3165_v29 = vadd.f32 %v3407_v52, %v3149_v46  ;;  %v3147_v25 = vadd.f32 %v5705_v60, %v3124_v47 }
 0x847   : > { %3173 = vst [vmem:[%s5714_s23 + $0x38] sm:$0xff] %v3165_v29  ;;  %v3163_v21 = vadd.f32 %v3405_v45, %v3147_v25 }
 0x849   : > { %3171 = vst [vmem:[%s5714_s23 + $0x28] sm:$0xff] %v3163_v21 }
 0x84a   : > { %v3816_v1 = vpop.f32.mrf.mxu0 }
 0x84b   : > { %v3113_v18 = vadd.f32 %v3816_v1, %v3048_v48 }
 0x84c   : > { %v3104_v62 = vpop.f32.mrf.mxu0 }
 0x84d   : > { %v3144_v55 = vadd.f32 %v5705_v60, %v3113_v18  ;;  %v3105_v53 = vadd.f32 %v3104_v62, %v3040_v41 }
 0x84e   : > { %v3817_v31 = vpop.f32.mrf.mxu0 }
 0x84f   : > { %v3160_v10 = vadd.f32 %v3402_v2, %v3144_v55  ;;  %v3142_v63 = vadd.f32 %v5705_v60, %v3105_v53  ;;  %v3116_v59 = vadd.f32 %v3817_v31, %v3051_v26 }
 0x850   : > { %v3107_v19 = vpop.f32.mrf.mxu0 }
 0x851   : > { %3168 = vst [vmem:[%s5714_s23 + $0x10] sm:$0xff] %v3160_v10  ;;  %v3158_v11 = vadd.f32 %v3400_v30, %v3142_v63  ;;  %v3145_v7 = vadd.f32 %v5705_v60, %v3116_v59  ;;  %v3108_v37 = vadd.f32 %v3107_v19, %v3043_v13 }
 0x853   : > { %3166 = vst [vmem:[%s5714_s23] sm:$0xff] %v3158_v11  ;;  %v3161_v40 = vadd.f32 %v3403_v39, %v3145_v7  ;;  %v3143_v57 = vadd.f32 %v5705_v60, %v3108_v37 }
 0x855   : > { %3169 = vst [vmem:[%s5714_s23 + $0x18] sm:$0xff] %v3161_v40  ;;  %v3159_v32 = vadd.f32 %v3401_v27, %v3143_v57 }
 0x857   : > { %3167 = vst [vmem:[%s5714_s23 + $0x8] sm:$0xff] %v3159_v32 }
 0x858   : > { %4146 = shalt.err (!%p4143_p3)
}
 0x859   : > { %s4147_s24 = scalar_lea.hbm %s5744_s15, 1024  ;;  %s4151_s27 = scalar_lea.hbm %s5804_s12, 2048 }
 0x85a   : > { %p4148_p4 = scmp.ne.s32.totalorder %s5744_s15, %s4147_s24  ;;  %p4152_p9 = scmp.lt.s32.totalorder %s5744_s15, %s5804_s12 }
 0x85b   : > { %p4153_p10 = scmp.lt.s32.totalorder %s4151_s27, %s4147_s24 }
 0x85c   : > { %p4149_p7 = pnand %p4148_p4, %p4309_p5 }
 0x85d   : > { %p4154_p11 = por %p4153_p10, %p4152_p9 }
 0x85e   : > { %p4150_p8 = pneg %p4149_p7 }
 0x860   : > { %p4155_p12 = pnand %p4154_p11, %p4150_p8 }
 0x862   : > { %4158 = shalt.err (!%p4155_p12)
}
 0x863   : > { %s4199_s14 = smov 128   ;;  %s4200_s16 = smov 8  }
 0x864   : > { %3839 = dma.vmem_to_hbm [thread:$0]  (%p4309_p5), %s5746_s17, 1024, %s5744_s15, %s5752_s29, %s4199_s14, %s4199_s14, %s4200_s16  }
 0x865 PF: > { %p3845_p13 = scmp.ge.s32.totalorder %s4193_s28, 2  ;;  %s3209_s20 = sand.u32 1, %s4181_s25  }
 0x866   : > { %s3210_s21 = scalar_lea.sflag [#allocation4], %s3209_s20 }
 0x867   : > { %p3842_p0 = pnand %p3845_p13, %p4313_p6 }
 0x869   : > { %p3843_p1 = pneg %p3842_p0 }
 0x86b   : > { %4176 = dma.done.wait (%p3843_p1), %s3210_s21, 1024  }
 0x86c   : > { %4178 = vsyncadd (%p3843_p1), %s3210_s21, 4294966272  ;;  %s5828_s28 = sld [smem:[#allocation7_spill]]  ;;  %s5831_s25 = smov %s4185_s26 }
 0x86d   : > { %s5829_s24 = sld [smem:[#allocation6_spill]] }
 0x86e   : > { %s5830_s27 = sld [smem:[#allocation8_spill]] }
 0x872   : > { %p24_p2 = scmp.ge.s32.totalorder %s5828_s28, 4  }
 0x873   : > { %s5832_s26 = smov %s5829_s24 }
 0x874   :  { %26 = sbr.rel (!%p24_p2) target bundleno = 5 (0x5), region = 117 }
 0x879   :  { %3221 = vsyncpa [#allocation4], 1 }
 0x87a   :  { %3223 = vsyncpa [#allocation4 + $0x1], 1 }

</bundles_post_ra>
